<compile_context>
chip_gen: v5e
topology: v5e:2x2
jax: 0.10.0
libtpu: 0.0.40
codegen_flags: <defaults>
</compile_context>

<pallas_src>
import jax
import jax.numpy as jnp
from jax.experimental import pallas as pl
from jax.experimental.pallas import tpu as pltpu


# Set to jnp.bfloat16 on v6e/v7x for ~2x HBM/MXU throughput (looser tolerance).
MXU_DTYPE = jnp.float32


def _classifier_kernel(mem_ref,      # VMEM (S, TB, H)   memory bank block (original layout)
                       bias_ref,     # VMEM (S, TB, 1)   additive length mask (0 / -1e30)
                       ws1t_ref,     # VMEM (H, A)       w_s1^T
                       ws2t_ref,     # VMEM (A, R)       w_s2^T
                       wclst_ref,    # VMEM (R*H, C)     w_cls^T
                       bcls_ref,     # VMEM (1, C)
                       woutt_ref,    # VMEM (C, 2)       w_out^T
                       bout_ref,     # VMEM (1, 2)
                       cls_ref,      # VMEM (TB, 2)      output logits
                       align_ref):   # VMEM (S, TB, R)   output attention weights
    S, TB, H = mem_ref.shape
    R = ws2t_ref.shape[1]
    C = wclst_ref.shape[1]
    cdt = ws1t_ref.dtype                                 # MXU operand dtype

    # --- attention scores: one flat (S*TB, H)@(H, A) then (S*TB, A)@(A, R) ---
    mem_flat = mem_ref[...].reshape(S * TB, H)           # leading-dim fold, no relayout
    hbar = jnp.tanh(jnp.dot(mem_flat, ws1t_ref[...],
                            preferred_element_type=jnp.float32))       # (S*TB, A) f32
    scores = jnp.dot(hbar.astype(cdt), ws2t_ref[...],
                     preferred_element_type=jnp.float32)               # (S*TB, R) f32
    scores = scores.reshape(S, TB, R) + bias_ref[...]                  # finite mask, NaN-free

    # --- masked softmax over src_len (leading, untiled axis -> pure VPU) -----
    m = scores[0]
    for s in range(1, S):
        m = jnp.maximum(m, scores[s])                                  # (TB, R)
    e = jnp.exp(scores - m[None, :, :])                                # (S, TB, R)
    denom = e[0]
    for s in range(1, S):
        denom = denom + e[s]                                           # (TB, R)
    p = e * pl.reciprocal(denom, approx=True)[None, :, :]              # EUP reciprocal
    align_ref[...] = p                                                 # natural layout store

    # --- attention read + w_cls, fused per hop (no (TB, R*H) flatten) --------
    # hidden = tanh( sum_r (sum_s p[s,:,r] * mem[s]) @ w_cls_r^T + b_cls )
    acc = jnp.zeros((TB, C), jnp.float32)
    for r in range(R):                                   # R is small & static
        out_r = p[0, :, r:r + 1] * mem_ref[0]            # (TB, H), f32
        for s in range(1, S):                            # VPU FMA chain over src_len
            out_r = out_r + p[s, :, r:r + 1] * mem_ref[s]
        acc = acc + jnp.dot(out_r.astype(cdt), wclst_ref[r * H:(r + 1) * H, :],
                            preferred_element_type=jnp.float32)
    hidden = jnp.tanh(acc + bcls_ref[...])                             # (TB, C) f32

    cls_ref[...] = (jnp.dot(hidden.astype(cdt), woutt_ref[...],
                            preferred_element_type=jnp.float32)
                    + bout_ref[...])                                   # (TB, 2)


def _cdiv(a, b):
    return -(-a // b)


def _choose_batch_tile(B, S, H, A, R, C):
    """Batch-tile TB: ~1 MiB mem tile/step, VMEM-capped, >=2 steps for big B."""
    eb = 4
    per_b_mem = S * H * eb
    target_block_bytes = 1 * 1024 * 1024
    vmem_budget = 32 * 1024 * 1024          # conservative for v7x's 64 MiB physical VMEM
    # double-buffered streamed blocks (mem, bias, align, cls) + rough intermediates
    per_b_vmem = (2 * (S * H + S + S * R + 2)
                  + S * (H + A + 2 * R) + (H + C)) * eb
    tb = max(1, target_block_bytes // per_b_mem)
    tb = min(tb, max(1, vmem_budget // per_b_vmem))
    tb = min(tb, 1024)                      # cap in-kernel intermediate footprint
    if B > 16:
        tb = min(tb, _cdiv(B, 2))           # keep nb >= 2: both v7x TCs get work
    if tb >= B:
        return B                            # one full-batch block (legal: == full dim)
    return max(8, (tb // 8) * 8)            # round down to 8 AFTER the caps


@jax.jit
def classifier_forward(memory_bank, lengths, params):
    """memory_bank: (src_len, batch, rnn_size) f32 (PyTorch layout); lengths: (batch,)."""
    ws1, ws2, wcls, bcls, wout, bout = params
    S, B, H = memory_bank.shape
    A = ws1.shape[0]
    R = ws2.shape[0]
    C = wcls.shape[0]

    TB = _choose_batch_tile(B, S, H, A, R, C)
    nb = _cdiv(B, TB)
    B_out = nb * TB                          # ragged last block handled by Pallas clipping

    # --- inputs: NO transpose / pad of memory_bank (streamed in-place) -------
    mem = memory_bank.astype(MXU_DTYPE)                                # (S, B, H)

    lens = lengths.astype(jnp.int32)
    bias = jnp.where(jnp.arange(S)[:, None] < lens[None, :],
                     0.0, -1e30).astype(jnp.float32)[:, :, None]       # (S, B, 1), tiny

    ws1_t = jnp.asarray(ws1, MXU_DTYPE).T                              # (H, A)
    ws2_t = jnp.asarray(ws2, MXU_DTYPE).T                              # (A, R)
    wcls_t = jnp.asarray(wcls, MXU_DTYPE).T                            # (R*H, C)
    bcls2 = jnp.asarray(bcls, jnp.float32).reshape(1, C)
    wout_t = jnp.asarray(wout, MXU_DTYPE).T                            # (C, 2)
    bout2 = jnp.asarray(bout, jnp.float32).reshape(1, 2)

    grid_spec = pltpu.PrefetchScalarGridSpec(
        num_scalar_prefetch=0,
        grid=(nb,),
        in_specs=[
            pl.BlockSpec((S, TB, H), lambda i: (0, i, 0)),   # memory bank block
            pl.BlockSpec((S, TB, 1), lambda i: (0, i, 0)),   # additive mask block
            pl.BlockSpec((H, A),     lambda i: (0, 0)),      # w_s1^T (resident)
            pl.BlockSpec((A, R),     lambda i: (0, 0)),      # w_s2^T
            pl.BlockSpec((R * H, C), lambda i: (0, 0)),      # w_cls^T
            pl.BlockSpec((1, C),     lambda i: (0, 0)),      # b_cls
            pl.BlockSpec((C, 2),     lambda i: (0, 0)),      # w_out^T
            pl.BlockSpec((1, 2),     lambda i: (0, 0)),      # b_out
        ],
        out_specs=[
            pl.BlockSpec((TB, 2),    lambda i: (i, 0)),      # cls logits
            pl.BlockSpec((S, TB, R), lambda i: (0, i, 0)),   # attention weights (natural)
        ],
    )

    flops = 2 * B * S * (H * A + A * R) + 2 * B * R * (S * H + H * C) + 4 * B * C
    transcendentals = B * S * A + B * R * S + B * C
    bytes_accessed = (B * S * (H + 1) + B * (2 + R * S)) * 4 \
        + (H * A + A * R + R * H * C + C + 2 * C + 2) * 4

    cls_p, align_p = pl.pallas_call(
        _classifier_kernel,
        out_shape=(jax.ShapeDtypeStruct((B_out, 2), jnp.float32),
                   jax.ShapeDtypeStruct((S, B_out, R), jnp.float32)),
        grid_spec=grid_spec,
        compiler_params=pltpu.CompilerParams(
            dimension_semantics=("parallel",),
            vmem_limit_bytes=48 * 1024 * 1024),
        cost_estimate=pl.CostEstimate(flops=flops,
                                      transcendentals=transcendentals,
                                      bytes_accessed=bytes_accessed),
    )(mem, bias, ws1_t, ws2_t, wcls_t, bcls2, wout_t, bout2)

    # Tiny layout fix-up on the small attention array (B*R*S elems), in the wrapper.
    w_score = jnp.transpose(align_p, (1, 2, 0))[:B]                    # (B, R, S)
    return cls_p[:B], w_score


def init_params(key, rnn_size, attn_dim, attn_hops, classifier_dim, fc_init_range=0.1):
    k1, k2, k3, k4, k5, k6 = jax.random.split(key, 6)
    ws1 = jax.random.uniform(k1, (attn_dim, rnn_size), jnp.float32,
                             -fc_init_range, fc_init_range)
    ws2 = jax.random.uniform(k2, (attn_hops, attn_dim), jnp.float32,
                             -fc_init_range, fc_init_range)
    fan_cls = rnn_size * attn_hops
    b1 = 1.0 / (fan_cls ** 0.5)
    wcls = jax.random.uniform(k3, (classifier_dim, fan_cls), jnp.float32, -b1, b1)
    bcls = jax.random.uniform(k4, (classifier_dim,), jnp.float32, -b1, b1)
    b2 = 1.0 / (classifier_dim ** 0.5)
    wout = jax.random.uniform(k5, (2, classifier_dim), jnp.float32, -b2, b2)
    bout = jax.random.uniform(k6, (2,), jnp.float32, -b2, b2)
    return (ws1, ws2, wcls, bcls, wout, bout)


def _reference(memory_bank, lengths, params):
    # Pure-JAX mirror of the PyTorch forward, for a sanity check.
    ws1, ws2, wcls, bcls, wout, bout = params
    S, B, H = memory_bank.shape
    mem = jnp.transpose(memory_bank, (1, 0, 2))                     # (B, S, H)
    hbar = jnp.tanh(jnp.einsum('bsh,ah->bsa', mem, ws1))
    align = jnp.einsum('bsa,ra->brs', hbar, ws2)                    # (B, R, S)
    pos = jnp.arange(S)[None, None, :]
    valid = pos < lengths[:, None, None]
    align = jnp.where(valid, align, -jnp.inf)
    p = jax.nn.softmax(align, axis=-1)
    out = jnp.einsum('brs,bsh->brh', p, mem).reshape(B, -1)
    hidden = jnp.tanh(out @ wcls.T + bcls)
    cls = hidden @ wout.T + bout
    return cls, p


if __name__ == "__main__":
    rnn_size, attn_dim, attn_hops, classifier_dim = 32, 16, 4, 32
    src_len, batch = 8, 24   # batch > TB(=8) so the grid has 3 (parallel) steps

    key = jax.random.PRNGKey(0)
    k_params, k_mem = jax.random.split(key)
    params = init_params(k_params, rnn_size, attn_dim, attn_hops, classifier_dim)

    memory_bank = jax.random.normal(k_mem, (src_len, batch, rnn_size), jnp.float32)
    lengths = jnp.array([(i % src_len) + 1 for i in range(batch)], dtype=jnp.int32)

    cls, w_score = classifier_forward(memory_bank, lengths, params)
    jax.block_until_ready((cls, w_score))

    ref_cls, ref_w = _reference(memory_bank, lengths, params)
    assert cls.shape == (batch, 2) and w_score.shape == (batch, attn_hops, src_len)
    assert jnp.allclose(cls, ref_cls, atol=2e-3, rtol=2e-3)
    assert jnp.allclose(w_score, ref_w, atol=2e-3, rtol=2e-3)

    print("KERNEL_OK")
</pallas_src>

<mosaic_0001>
module attributes {stable_mosaic.version = 11 : i64} {
  func.func @_classifier_kernel(%arg0: i32, %arg1: memref<8x8x32xf32, #tpu.memory_space<vmem>>, %arg2: memref<8x8x1xf32, #tpu.memory_space<vmem>>, %arg3: memref<32x16xf32, #tpu.memory_space<vmem>>, %arg4: memref<16x4xf32, #tpu.memory_space<vmem>>, %arg5: memref<128x32xf32, #tpu.memory_space<vmem>>, %arg6: memref<1x32xf32, #tpu.memory_space<vmem>>, %arg7: memref<32x2xf32, #tpu.memory_space<vmem>>, %arg8: memref<1x2xf32, #tpu.memory_space<vmem>>, %arg9: memref<8x2xf32, #tpu.memory_space<vmem>>, %arg10: memref<8x8x4xf32, #tpu.memory_space<vmem>>) attributes {dimension_semantics = [#tpu.dimension_semantics<parallel>], iteration_bounds = array<i64: 3>, scalar_prefetch = 0 : i64, scratch_operands = 0 : i64, tpu.core_type = #tpu.core_type<tc>, window_params = [{transform_indices = @transform_0, window_bounds = array<i64: 8, 8, 32>}, {transform_indices = @transform_1, window_bounds = array<i64: 8, 8, 1>}, {pipeline_mode = #tpu.pipeline_mode<synchronous>, transform_indices = @transform_2, window_bounds = array<i64: 32, 16>}, {pipeline_mode = #tpu.pipeline_mode<synchronous>, transform_indices = @transform_3, window_bounds = array<i64: 16, 4>}, {pipeline_mode = #tpu.pipeline_mode<synchronous>, transform_indices = @transform_4, window_bounds = array<i64: 128, 32>}, {pipeline_mode = #tpu.pipeline_mode<synchronous>, transform_indices = @transform_5, window_bounds = array<i64: 1, 32>}, {pipeline_mode = #tpu.pipeline_mode<synchronous>, transform_indices = @transform_6, window_bounds = array<i64: 32, 2>}, {pipeline_mode = #tpu.pipeline_mode<synchronous>, transform_indices = @transform_7, window_bounds = array<i64: 1, 2>}, {transform_indices = @transform_8, window_bounds = array<i64: 8, 2>}, {transform_indices = @transform_9, window_bounds = array<i64: 8, 8, 4>}]} {
    %c0 = arith.constant 0 : index
    %c0_0 = arith.constant 0 : index
    %c0_1 = arith.constant 0 : index
    %0 = vector.load %arg1[%c0, %c0_0, %c0_1] : memref<8x8x32xf32, #tpu.memory_space<vmem>>, vector<8x8x32xf32>
    %1 = vector.shape_cast %0 : vector<8x8x32xf32> to vector<64x32xf32>
    %c0_2 = arith.constant 0 : index
    %c0_3 = arith.constant 0 : index
    %2 = vector.load %arg3[%c0_2, %c0_3] : memref<32x16xf32, #tpu.memory_space<vmem>>, vector<32x16xf32>
    %cst = arith.constant dense<0.000000e+00> : vector<64x16xf32>
    %3 = tpu.matmul %1, %2, %cst {dimension_numbers = #tpu.dot_dimension_numbers<[1], [0], [0], [1], [0, 0, 1, 1], [], []>} : vector<64x32xf32>, vector<32x16xf32>, vector<64x16xf32> -> vector<64x16xf32>
    %4 = math.tanh %3 : vector<64x16xf32>
    %c0_4 = arith.constant 0 : index
    %c0_5 = arith.constant 0 : index
    %5 = vector.load %arg4[%c0_4, %c0_5] : memref<16x4xf32, #tpu.memory_space<vmem>>, vector<16x4xf32>
    %cst_6 = arith.constant dense<0.000000e+00> : vector<64x4xf32>
    %6 = tpu.matmul %4, %5, %cst_6 {dimension_numbers = #tpu.dot_dimension_numbers<[1], [0], [0], [1], [0, 0, 1, 1], [], []>} : vector<64x16xf32>, vector<16x4xf32>, vector<64x4xf32> -> vector<64x4xf32>
    %7 = vector.shape_cast %6 : vector<64x4xf32> to vector<8x8x4xf32>
    %c0_7 = arith.constant 0 : index
    %c0_8 = arith.constant 0 : index
    %c0_9 = arith.constant 0 : index
    %8 = vector.load %arg2[%c0_7, %c0_8, %c0_9] : memref<8x8x1xf32, #tpu.memory_space<vmem>>, vector<8x8x1xf32>
    %9 = vector.broadcast %8 : vector<8x8x1xf32> to vector<8x8x4xf32>
    %10 = arith.addf %7, %9 : vector<8x8x4xf32>
    %11 = vector.extract_strided_slice %10 {offsets = [0, 0, 0], sizes = [1, 8, 4], strides = [1, 1, 1]} : vector<8x8x4xf32> to vector<1x8x4xf32>
    %12 = vector.shape_cast %11 : vector<1x8x4xf32> to vector<8x4xf32>
    %13 = vector.extract_strided_slice %10 {offsets = [1, 0, 0], sizes = [1, 8, 4], strides = [1, 1, 1]} : vector<8x8x4xf32> to vector<1x8x4xf32>
    %14 = vector.shape_cast %13 : vector<1x8x4xf32> to vector<8x4xf32>
    %15 = arith.maximumf %12, %14 : vector<8x4xf32>
    %16 = vector.extract_strided_slice %10 {offsets = [2, 0, 0], sizes = [1, 8, 4], strides = [1, 1, 1]} : vector<8x8x4xf32> to vector<1x8x4xf32>
    %17 = vector.shape_cast %16 : vector<1x8x4xf32> to vector<8x4xf32>
    %18 = arith.maximumf %15, %17 : vector<8x4xf32>
    %19 = vector.extract_strided_slice %10 {offsets = [3, 0, 0], sizes = [1, 8, 4], strides = [1, 1, 1]} : vector<8x8x4xf32> to vector<1x8x4xf32>
    %20 = vector.shape_cast %19 : vector<1x8x4xf32> to vector<8x4xf32>
    %21 = arith.maximumf %18, %20 : vector<8x4xf32>
    %22 = vector.extract_strided_slice %10 {offsets = [4, 0, 0], sizes = [1, 8, 4], strides = [1, 1, 1]} : vector<8x8x4xf32> to vector<1x8x4xf32>
    %23 = vector.shape_cast %22 : vector<1x8x4xf32> to vector<8x4xf32>
    %24 = arith.maximumf %21, %23 : vector<8x4xf32>
    %25 = vector.extract_strided_slice %10 {offsets = [5, 0, 0], sizes = [1, 8, 4], strides = [1, 1, 1]} : vector<8x8x4xf32> to vector<1x8x4xf32>
    %26 = vector.shape_cast %25 : vector<1x8x4xf32> to vector<8x4xf32>
    %27 = arith.maximumf %24, %26 : vector<8x4xf32>
    %28 = vector.extract_strided_slice %10 {offsets = [6, 0, 0], sizes = [1, 8, 4], strides = [1, 1, 1]} : vector<8x8x4xf32> to vector<1x8x4xf32>
    %29 = vector.shape_cast %28 : vector<1x8x4xf32> to vector<8x4xf32>
    %30 = arith.maximumf %27, %29 : vector<8x4xf32>
    %31 = vector.extract_strided_slice %10 {offsets = [7, 0, 0], sizes = [1, 8, 4], strides = [1, 1, 1]} : vector<8x8x4xf32> to vector<1x8x4xf32>
    %32 = vector.shape_cast %31 : vector<1x8x4xf32> to vector<8x4xf32>
    %33 = arith.maximumf %30, %32 : vector<8x4xf32>
    %34 = vector.shape_cast %33 : vector<8x4xf32> to vector<1x8x4xf32>
    %35 = vector.broadcast %34 : vector<1x8x4xf32> to vector<8x8x4xf32>
    %36 = arith.subf %10, %35 : vector<8x8x4xf32>
    %37 = math.exp %36 : vector<8x8x4xf32>
    %38 = vector.extract_strided_slice %37 {offsets = [0, 0, 0], sizes = [1, 8, 4], strides = [1, 1, 1]} : vector<8x8x4xf32> to vector<1x8x4xf32>
    %39 = vector.shape_cast %38 : vector<1x8x4xf32> to vector<8x4xf32>
    %40 = vector.extract_strided_slice %37 {offsets = [1, 0, 0], sizes = [1, 8, 4], strides = [1, 1, 1]} : vector<8x8x4xf32> to vector<1x8x4xf32>
    %41 = vector.shape_cast %40 : vector<1x8x4xf32> to vector<8x4xf32>
    %42 = arith.addf %39, %41 : vector<8x4xf32>
    %43 = vector.extract_strided_slice %37 {offsets = [2, 0, 0], sizes = [1, 8, 4], strides = [1, 1, 1]} : vector<8x8x4xf32> to vector<1x8x4xf32>
    %44 = vector.shape_cast %43 : vector<1x8x4xf32> to vector<8x4xf32>
    %45 = arith.addf %42, %44 : vector<8x4xf32>
    %46 = vector.extract_strided_slice %37 {offsets = [3, 0, 0], sizes = [1, 8, 4], strides = [1, 1, 1]} : vector<8x8x4xf32> to vector<1x8x4xf32>
    %47 = vector.shape_cast %46 : vector<1x8x4xf32> to vector<8x4xf32>
    %48 = arith.addf %45, %47 : vector<8x4xf32>
    %49 = vector.extract_strided_slice %37 {offsets = [4, 0, 0], sizes = [1, 8, 4], strides = [1, 1, 1]} : vector<8x8x4xf32> to vector<1x8x4xf32>
    %50 = vector.shape_cast %49 : vector<1x8x4xf32> to vector<8x4xf32>
    %51 = arith.addf %48, %50 : vector<8x4xf32>
    %52 = vector.extract_strided_slice %37 {offsets = [5, 0, 0], sizes = [1, 8, 4], strides = [1, 1, 1]} : vector<8x8x4xf32> to vector<1x8x4xf32>
    %53 = vector.shape_cast %52 : vector<1x8x4xf32> to vector<8x4xf32>
    %54 = arith.addf %51, %53 : vector<8x4xf32>
    %55 = vector.extract_strided_slice %37 {offsets = [6, 0, 0], sizes = [1, 8, 4], strides = [1, 1, 1]} : vector<8x8x4xf32> to vector<1x8x4xf32>
    %56 = vector.shape_cast %55 : vector<1x8x4xf32> to vector<8x4xf32>
    %57 = arith.addf %54, %56 : vector<8x4xf32>
    %58 = vector.extract_strided_slice %37 {offsets = [7, 0, 0], sizes = [1, 8, 4], strides = [1, 1, 1]} : vector<8x8x4xf32> to vector<1x8x4xf32>
    %59 = vector.shape_cast %58 : vector<1x8x4xf32> to vector<8x4xf32>
    %60 = arith.addf %57, %59 : vector<8x4xf32>
    %61 = tpu.reciprocal %60 {approx = true} : vector<8x4xf32> -> vector<8x4xf32>
    %62 = vector.shape_cast %61 : vector<8x4xf32> to vector<1x8x4xf32>
    %63 = vector.broadcast %62 : vector<1x8x4xf32> to vector<8x8x4xf32>
    %64 = arith.mulf %37, %63 : vector<8x8x4xf32>
    %c0_10 = arith.constant 0 : index
    %c0_11 = arith.constant 0 : index
    %c0_12 = arith.constant 0 : index
    %65 = vector.load %arg10[%c0_10, %c0_11, %c0_12] : memref<8x8x4xf32, #tpu.memory_space<vmem>>, vector<8x8x4xf32>
    tpu.vector_store %arg10[%c0_10, %c0_11, %c0_12], %64 {strides = array<i32>} : memref<8x8x4xf32, #tpu.memory_space<vmem>>, vector<8x8x4xf32>,
    %cst_13 = arith.constant 0.000000e+00 : f32
    %66 = vector.broadcast %cst_13 : f32 to vector<8x32xf32>
    %67 = vector.extract_strided_slice %64 {offsets = [0, 0, 0], sizes = [1, 8, 1], strides = [1, 1, 1]} : vector<8x8x4xf32> to vector<1x8x1xf32>
    %68 = vector.shape_cast %67 : vector<1x8x1xf32> to vector<8x1xf32>
    %c0_14 = arith.constant 0 : index
    %c0_15 = arith.constant 0 : index
    %c0_16 = arith.constant 0 : index
    %69 = vector.load %arg1[%c0_14, %c0_15, %c0_16] : memref<8x8x32xf32, #tpu.memory_space<vmem>>, vector<1x8x32xf32>
    %70 = vector.shape_cast %69 : vector<1x8x32xf32> to vector<8x32xf32>
    %71 = vector.broadcast %68 : vector<8x1xf32> to vector<8x32xf32>
    %72 = arith.mulf %71, %70 : vector<8x32xf32>
    %73 = vector.extract_strided_slice %64 {offsets = [1, 0, 0], sizes = [1, 8, 1], strides = [1, 1, 1]} : vector<8x8x4xf32> to vector<1x8x1xf32>
    %74 = vector.shape_cast %73 : vector<1x8x1xf32> to vector<8x1xf32>
    %c1 = arith.constant 1 : index
    %c0_17 = arith.constant 0 : index
    %c0_18 = arith.constant 0 : index
    %75 = vector.load %arg1[%c1, %c0_17, %c0_18] : memref<8x8x32xf32, #tpu.memory_space<vmem>>, vector<1x8x32xf32>
    %76 = vector.shape_cast %75 : vector<1x8x32xf32> to vector<8x32xf32>
    %77 = vector.broadcast %74 : vector<8x1xf32> to vector<8x32xf32>
    %78 = arith.mulf %77, %76 : vector<8x32xf32>
    %79 = arith.addf %72, %78 : vector<8x32xf32>
    %80 = vector.extract_strided_slice %64 {offsets = [2, 0, 0], sizes = [1, 8, 1], strides = [1, 1, 1]} : vector<8x8x4xf32> to vector<1x8x1xf32>
    %81 = vector.shape_cast %80 : vector<1x8x1xf32> to vector<8x1xf32>
    %c2 = arith.constant 2 : index
    %c0_19 = arith.constant 0 : index
    %c0_20 = arith.constant 0 : index
    %82 = vector.load %arg1[%c2, %c0_19, %c0_20] : memref<8x8x32xf32, #tpu.memory_space<vmem>>, vector<1x8x32xf32>
    %83 = vector.shape_cast %82 : vector<1x8x32xf32> to vector<8x32xf32>
    %84 = vector.broadcast %81 : vector<8x1xf32> to vector<8x32xf32>
    %85 = arith.mulf %84, %83 : vector<8x32xf32>
    %86 = arith.addf %79, %85 : vector<8x32xf32>
    %87 = vector.extract_strided_slice %64 {offsets = [3, 0, 0], sizes = [1, 8, 1], strides = [1, 1, 1]} : vector<8x8x4xf32> to vector<1x8x1xf32>
    %88 = vector.shape_cast %87 : vector<1x8x1xf32> to vector<8x1xf32>
    %c3 = arith.constant 3 : index
    %c0_21 = arith.constant 0 : index
    %c0_22 = arith.constant 0 : index
    %89 = vector.load %arg1[%c3, %c0_21, %c0_22] : memref<8x8x32xf32, #tpu.memory_space<vmem>>, vector<1x8x32xf32>
    %90 = vector.shape_cast %89 : vector<1x8x32xf32> to vector<8x32xf32>
    %91 = vector.broadcast %88 : vector<8x1xf32> to vector<8x32xf32>
    %92 = arith.mulf %91, %90 : vector<8x32xf32>
    %93 = arith.addf %86, %92 : vector<8x32xf32>
    %94 = vector.extract_strided_slice %64 {offsets = [4, 0, 0], sizes = [1, 8, 1], strides = [1, 1, 1]} : vector<8x8x4xf32> to vector<1x8x1xf32>
    %95 = vector.shape_cast %94 : vector<1x8x1xf32> to vector<8x1xf32>
    %c4 = arith.constant 4 : index
    %c0_23 = arith.constant 0 : index
    %c0_24 = arith.constant 0 : index
    %96 = vector.load %arg1[%c4, %c0_23, %c0_24] : memref<8x8x32xf32, #tpu.memory_space<vmem>>, vector<1x8x32xf32>
    %97 = vector.shape_cast %96 : vector<1x8x32xf32> to vector<8x32xf32>
    %98 = vector.broadcast %95 : vector<8x1xf32> to vector<8x32xf32>
    %99 = arith.mulf %98, %97 : vector<8x32xf32>
    %100 = arith.addf %93, %99 : vector<8x32xf32>
    %101 = vector.extract_strided_slice %64 {offsets = [5, 0, 0], sizes = [1, 8, 1], strides = [1, 1, 1]} : vector<8x8x4xf32> to vector<1x8x1xf32>
    %102 = vector.shape_cast %101 : vector<1x8x1xf32> to vector<8x1xf32>
    %c5 = arith.constant 5 : index
    %c0_25 = arith.constant 0 : index
    %c0_26 = arith.constant 0 : index
    %103 = vector.load %arg1[%c5, %c0_25, %c0_26] : memref<8x8x32xf32, #tpu.memory_space<vmem>>, vector<1x8x32xf32>
    %104 = vector.shape_cast %103 : vector<1x8x32xf32> to vector<8x32xf32>
    %105 = vector.broadcast %102 : vector<8x1xf32> to vector<8x32xf32>
    %106 = arith.mulf %105, %104 : vector<8x32xf32>
    %107 = arith.addf %100, %106 : vector<8x32xf32>
    %108 = vector.extract_strided_slice %64 {offsets = [6, 0, 0], sizes = [1, 8, 1], strides = [1, 1, 1]} : vector<8x8x4xf32> to vector<1x8x1xf32>
    %109 = vector.shape_cast %108 : vector<1x8x1xf32> to vector<8x1xf32>
    %c6 = arith.constant 6 : index
    %c0_27 = arith.constant 0 : index
    %c0_28 = arith.constant 0 : index
    %110 = vector.load %arg1[%c6, %c0_27, %c0_28] : memref<8x8x32xf32, #tpu.memory_space<vmem>>, vector<1x8x32xf32>
    %111 = vector.shape_cast %110 : vector<1x8x32xf32> to vector<8x32xf32>
    %112 = vector.broadcast %109 : vector<8x1xf32> to vector<8x32xf32>
    %113 = arith.mulf %112, %111 : vector<8x32xf32>
    %114 = arith.addf %107, %113 : vector<8x32xf32>
    %115 = vector.extract_strided_slice %64 {offsets = [7, 0, 0], sizes = [1, 8, 1], strides = [1, 1, 1]} : vector<8x8x4xf32> to vector<1x8x1xf32>
    %116 = vector.shape_cast %115 : vector<1x8x1xf32> to vector<8x1xf32>
    %c7 = arith.constant 7 : index
    %c0_29 = arith.constant 0 : index
    %c0_30 = arith.constant 0 : index
    %117 = vector.load %arg1[%c7, %c0_29, %c0_30] : memref<8x8x32xf32, #tpu.memory_space<vmem>>, vector<1x8x32xf32>
    %118 = vector.shape_cast %117 : vector<1x8x32xf32> to vector<8x32xf32>
    %119 = vector.broadcast %116 : vector<8x1xf32> to vector<8x32xf32>
    %120 = arith.mulf %119, %118 : vector<8x32xf32>
    %121 = arith.addf %114, %120 : vector<8x32xf32>
    %c0_31 = arith.constant 0 : index
    %c0_32 = arith.constant 0 : index
    %122 = vector.load %arg5[%c0_31, %c0_32] : memref<128x32xf32, #tpu.memory_space<vmem>>, vector<32x32xf32>
    %cst_33 = arith.constant dense<0.000000e+00> : vector<8x32xf32>
    %123 = tpu.matmul %121, %122, %cst_33 {dimension_numbers = #tpu.dot_dimension_numbers<[1], [0], [0], [1], [0, 0, 1, 1], [], []>} : vector<8x32xf32>, vector<32x32xf32>, vector<8x32xf32> -> vector<8x32xf32>
    %124 = arith.addf %66, %123 : vector<8x32xf32>
    %125 = vector.extract_strided_slice %64 {offsets = [0, 0, 1], sizes = [1, 8, 1], strides = [1, 1, 1]} : vector<8x8x4xf32> to vector<1x8x1xf32>
    %126 = vector.shape_cast %125 : vector<1x8x1xf32> to vector<8x1xf32>
    %c0_34 = arith.constant 0 : index
    %c0_35 = arith.constant 0 : index
    %c0_36 = arith.constant 0 : index
    %127 = vector.load %arg1[%c0_34, %c0_35, %c0_36] : memref<8x8x32xf32, #tpu.memory_space<vmem>>, vector<1x8x32xf32>
    %128 = vector.shape_cast %127 : vector<1x8x32xf32> to vector<8x32xf32>
    %129 = vector.broadcast %126 : vector<8x1xf32> to vector<8x32xf32>
    %130 = arith.mulf %129, %128 : vector<8x32xf32>
    %131 = vector.extract_strided_slice %64 {offsets = [1, 0, 1], sizes = [1, 8, 1], strides = [1, 1, 1]} : vector<8x8x4xf32> to vector<1x8x1xf32>
    %132 = vector.shape_cast %131 : vector<1x8x1xf32> to vector<8x1xf32>
    %c1_37 = arith.constant 1 : index
    %c0_38 = arith.constant 0 : index
    %c0_39 = arith.constant 0 : index
    %133 = vector.load %arg1[%c1_37, %c0_38, %c0_39] : memref<8x8x32xf32, #tpu.memory_space<vmem>>, vector<1x8x32xf32>
    %134 = vector.shape_cast %133 : vector<1x8x32xf32> to vector<8x32xf32>
    %135 = vector.broadcast %132 : vector<8x1xf32> to vector<8x32xf32>
    %136 = arith.mulf %135, %134 : vector<8x32xf32>
    %137 = arith.addf %130, %136 : vector<8x32xf32>
    %138 = vector.extract_strided_slice %64 {offsets = [2, 0, 1], sizes = [1, 8, 1], strides = [1, 1, 1]} : vector<8x8x4xf32> to vector<1x8x1xf32>
    %139 = vector.shape_cast %138 : vector<1x8x1xf32> to vector<8x1xf32>
    %c2_40 = arith.constant 2 : index
    %c0_41 = arith.constant 0 : index
    %c0_42 = arith.constant 0 : index
    %140 = vector.load %arg1[%c2_40, %c0_41, %c0_42] : memref<8x8x32xf32, #tpu.memory_space<vmem>>, vector<1x8x32xf32>
    %141 = vector.shape_cast %140 : vector<1x8x32xf32> to vector<8x32xf32>
    %142 = vector.broadcast %139 : vector<8x1xf32> to vector<8x32xf32>
    %143 = arith.mulf %142, %141 : vector<8x32xf32>
    %144 = arith.addf %137, %143 : vector<8x32xf32>
    %145 = vector.extract_strided_slice %64 {offsets = [3, 0, 1], sizes = [1, 8, 1], strides = [1, 1, 1]} : vector<8x8x4xf32> to vector<1x8x1xf32>
    %146 = vector.shape_cast %145 : vector<1x8x1xf32> to vector<8x1xf32>
    %c3_43 = arith.constant 3 : index
    %c0_44 = arith.constant 0 : index
    %c0_45 = arith.constant 0 : index
    %147 = vector.load %arg1[%c3_43, %c0_44, %c0_45] : memref<8x8x32xf32, #tpu.memory_space<vmem>>, vector<1x8x32xf32>
    %148 = vector.shape_cast %147 : vector<1x8x32xf32> to vector<8x32xf32>
    %149 = vector.broadcast %146 : vector<8x1xf32> to vector<8x32xf32>
    %150 = arith.mulf %149, %148 : vector<8x32xf32>
    %151 = arith.addf %144, %150 : vector<8x32xf32>
    %152 = vector.extract_strided_slice %64 {offsets = [4, 0, 1], sizes = [1, 8, 1], strides = [1, 1, 1]} : vector<8x8x4xf32> to vector<1x8x1xf32>
    %153 = vector.shape_cast %152 : vector<1x8x1xf32> to vector<8x1xf32>
    %c4_46 = arith.constant 4 : index
    %c0_47 = arith.constant 0 : index
    %c0_48 = arith.constant 0 : index
    %154 = vector.load %arg1[%c4_46, %c0_47, %c0_48] : memref<8x8x32xf32, #tpu.memory_space<vmem>>, vector<1x8x32xf32>
    %155 = vector.shape_cast %154 : vector<1x8x32xf32> to vector<8x32xf32>
    %156 = vector.broadcast %153 : vector<8x1xf32> to vector<8x32xf32>
    %157 = arith.mulf %156, %155 : vector<8x32xf32>
    %158 = arith.addf %151, %157 : vector<8x32xf32>
    %159 = vector.extract_strided_slice %64 {offsets = [5, 0, 1], sizes = [1, 8, 1], strides = [1, 1, 1]} : vector<8x8x4xf32> to vector<1x8x1xf32>
    %160 = vector.shape_cast %159 : vector<1x8x1xf32> to vector<8x1xf32>
    %c5_49 = arith.constant 5 : index
    %c0_50 = arith.constant 0 : index
    %c0_51 = arith.constant 0 : index
    %161 = vector.load %arg1[%c5_49, %c0_50, %c0_51] : memref<8x8x32xf32, #tpu.memory_space<vmem>>, vector<1x8x32xf32>
    %162 = vector.shape_cast %161 : vector<1x8x32xf32> to vector<8x32xf32>
    %163 = vector.broadcast %160 : vector<8x1xf32> to vector<8x32xf32>
    %164 = arith.mulf %163, %162 : vector<8x32xf32>
    %165 = arith.addf %158, %164 : vector<8x32xf32>
    %166 = vector.extract_strided_slice %64 {offsets = [6, 0, 1], sizes = [1, 8, 1], strides = [1, 1, 1]} : vector<8x8x4xf32> to vector<1x8x1xf32>
    %167 = vector.shape_cast %166 : vector<1x8x1xf32> to vector<8x1xf32>
    %c6_52 = arith.constant 6 : index
    %c0_53 = arith.constant 0 : index
    %c0_54 = arith.constant 0 : index
    %168 = vector.load %arg1[%c6_52, %c0_53, %c0_54] : memref<8x8x32xf32, #tpu.memory_space<vmem>>, vector<1x8x32xf32>
    %169 = vector.shape_cast %168 : vector<1x8x32xf32> to vector<8x32xf32>
    %170 = vector.broadcast %167 : vector<8x1xf32> to vector<8x32xf32>
    %171 = arith.mulf %170, %169 : vector<8x32xf32>
    %172 = arith.addf %165, %171 : vector<8x32xf32>
    %173 = vector.extract_strided_slice %64 {offsets = [7, 0, 1], sizes = [1, 8, 1], strides = [1, 1, 1]} : vector<8x8x4xf32> to vector<1x8x1xf32>
    %174 = vector.shape_cast %173 : vector<1x8x1xf32> to vector<8x1xf32>
    %c7_55 = arith.constant 7 : index
    %c0_56 = arith.constant 0 : index
    %c0_57 = arith.constant 0 : index
    %175 = vector.load %arg1[%c7_55, %c0_56, %c0_57] : memref<8x8x32xf32, #tpu.memory_space<vmem>>, vector<1x8x32xf32>
    %176 = vector.shape_cast %175 : vector<1x8x32xf32> to vector<8x32xf32>
    %177 = vector.broadcast %174 : vector<8x1xf32> to vector<8x32xf32>
    %178 = arith.mulf %177, %176 : vector<8x32xf32>
    %179 = arith.addf %172, %178 : vector<8x32xf32>
    %c32 = arith.constant 32 : index
    %c0_58 = arith.constant 0 : index
    %180 = vector.load %arg5[%c32, %c0_58] : memref<128x32xf32, #tpu.memory_space<vmem>>, vector<32x32xf32>
    %cst_59 = arith.constant dense<0.000000e+00> : vector<8x32xf32>
    %181 = tpu.matmul %179, %180, %cst_59 {dimension_numbers = #tpu.dot_dimension_numbers<[1], [0], [0], [1], [0, 0, 1, 1], [], []>} : vector<8x32xf32>, vector<32x32xf32>, vector<8x32xf32> -> vector<8x32xf32>
    %182 = arith.addf %124, %181 : vector<8x32xf32>
    %183 = vector.extract_strided_slice %64 {offsets = [0, 0, 2], sizes = [1, 8, 1], strides = [1, 1, 1]} : vector<8x8x4xf32> to vector<1x8x1xf32>
    %184 = vector.shape_cast %183 : vector<1x8x1xf32> to vector<8x1xf32>
    %c0_60 = arith.constant 0 : index
    %c0_61 = arith.constant 0 : index
    %c0_62 = arith.constant 0 : index
    %185 = vector.load %arg1[%c0_60, %c0_61, %c0_62] : memref<8x8x32xf32, #tpu.memory_space<vmem>>, vector<1x8x32xf32>
    %186 = vector.shape_cast %185 : vector<1x8x32xf32> to vector<8x32xf32>
    %187 = vector.broadcast %184 : vector<8x1xf32> to vector<8x32xf32>
    %188 = arith.mulf %187, %186 : vector<8x32xf32>
    %189 = vector.extract_strided_slice %64 {offsets = [1, 0, 2], sizes = [1, 8, 1], strides = [1, 1, 1]} : vector<8x8x4xf32> to vector<1x8x1xf32>
    %190 = vector.shape_cast %189 : vector<1x8x1xf32> to vector<8x1xf32>
    %c1_63 = arith.constant 1 : index
    %c0_64 = arith.constant 0 : index
    %c0_65 = arith.constant 0 : index
    %191 = vector.load %arg1[%c1_63, %c0_64, %c0_65] : memref<8x8x32xf32, #tpu.memory_space<vmem>>, vector<1x8x32xf32>
    %192 = vector.shape_cast %191 : vector<1x8x32xf32> to vector<8x32xf32>
    %193 = vector.broadcast %190 : vector<8x1xf32> to vector<8x32xf32>
    %194 = arith.mulf %193, %192 : vector<8x32xf32>
    %195 = arith.addf %188, %194 : vector<8x32xf32>
    %196 = vector.extract_strided_slice %64 {offsets = [2, 0, 2], sizes = [1, 8, 1], strides = [1, 1, 1]} : vector<8x8x4xf32> to vector<1x8x1xf32>
    %197 = vector.shape_cast %196 : vector<1x8x1xf32> to vector<8x1xf32>
    %c2_66 = arith.constant 2 : index
    %c0_67 = arith.constant 0 : index
    %c0_68 = arith.constant 0 : index
    %198 = vector.load %arg1[%c2_66, %c0_67, %c0_68] : memref<8x8x32xf32, #tpu.memory_space<vmem>>, vector<1x8x32xf32>
    %199 = vector.shape_cast %198 : vector<1x8x32xf32> to vector<8x32xf32>
    %200 = vector.broadcast %197 : vector<8x1xf32> to vector<8x32xf32>
    %201 = arith.mulf %200, %199 : vector<8x32xf32>
    %202 = arith.addf %195, %201 : vector<8x32xf32>
    %203 = vector.extract_strided_slice %64 {offsets = [3, 0, 2], sizes = [1, 8, 1], strides = [1, 1, 1]} : vector<8x8x4xf32> to vector<1x8x1xf32>
    %204 = vector.shape_cast %203 : vector<1x8x1xf32> to vector<8x1xf32>
    %c3_69 = arith.constant 3 : index
    %c0_70 = arith.constant 0 : index
    %c0_71 = arith.constant 0 : index
    %205 = vector.load %arg1[%c3_69, %c0_70, %c0_71] : memref<8x8x32xf32, #tpu.memory_space<vmem>>, vector<1x8x32xf32>
    %206 = vector.shape_cast %205 : vector<1x8x32xf32> to vector<8x32xf32>
    %207 = vector.broadcast %204 : vector<8x1xf32> to vector<8x32xf32>
    %208 = arith.mulf %207, %206 : vector<8x32xf32>
    %209 = arith.addf %202, %208 : vector<8x32xf32>
    %210 = vector.extract_strided_slice %64 {offsets = [4, 0, 2], sizes = [1, 8, 1], strides = [1, 1, 1]} : vector<8x8x4xf32> to vector<1x8x1xf32>
    %211 = vector.shape_cast %210 : vector<1x8x1xf32> to vector<8x1xf32>
    %c4_72 = arith.constant 4 : index
    %c0_73 = arith.constant 0 : index
    %c0_74 = arith.constant 0 : index
    %212 = vector.load %arg1[%c4_72, %c0_73, %c0_74] : memref<8x8x32xf32, #tpu.memory_space<vmem>>, vector<1x8x32xf32>
    %213 = vector.shape_cast %212 : vector<1x8x32xf32> to vector<8x32xf32>
    %214 = vector.broadcast %211 : vector<8x1xf32> to vector<8x32xf32>
    %215 = arith.mulf %214, %213 : vector<8x32xf32>
    %216 = arith.addf %209, %215 : vector<8x32xf32>
    %217 = vector.extract_strided_slice %64 {offsets = [5, 0, 2], sizes = [1, 8, 1], strides = [1, 1, 1]} : vector<8x8x4xf32> to vector<1x8x1xf32>
    %218 = vector.shape_cast %217 : vector<1x8x1xf32> to vector<8x1xf32>
    %c5_75 = arith.constant 5 : index
    %c0_76 = arith.constant 0 : index
    %c0_77 = arith.constant 0 : index
    %219 = vector.load %arg1[%c5_75, %c0_76, %c0_77] : memref<8x8x32xf32, #tpu.memory_space<vmem>>, vector<1x8x32xf32>
    %220 = vector.shape_cast %219 : vector<1x8x32xf32> to vector<8x32xf32>
    %221 = vector.broadcast %218 : vector<8x1xf32> to vector<8x32xf32>
    %222 = arith.mulf %221, %220 : vector<8x32xf32>
    %223 = arith.addf %216, %222 : vector<8x32xf32>
    %224 = vector.extract_strided_slice %64 {offsets = [6, 0, 2], sizes = [1, 8, 1], strides = [1, 1, 1]} : vector<8x8x4xf32> to vector<1x8x1xf32>
    %225 = vector.shape_cast %224 : vector<1x8x1xf32> to vector<8x1xf32>
    %c6_78 = arith.constant 6 : index
    %c0_79 = arith.constant 0 : index
    %c0_80 = arith.constant 0 : index
    %226 = vector.load %arg1[%c6_78, %c0_79, %c0_80] : memref<8x8x32xf32, #tpu.memory_space<vmem>>, vector<1x8x32xf32>
    %227 = vector.shape_cast %226 : vector<1x8x32xf32> to vector<8x32xf32>
    %228 = vector.broadcast %225 : vector<8x1xf32> to vector<8x32xf32>
    %229 = arith.mulf %228, %227 : vector<8x32xf32>
    %230 = arith.addf %223, %229 : vector<8x32xf32>
    %231 = vector.extract_strided_slice %64 {offsets = [7, 0, 2], sizes = [1, 8, 1], strides = [1, 1, 1]} : vector<8x8x4xf32> to vector<1x8x1xf32>
    %232 = vector.shape_cast %231 : vector<1x8x1xf32> to vector<8x1xf32>
    %c7_81 = arith.constant 7 : index
    %c0_82 = arith.constant 0 : index
    %c0_83 = arith.constant 0 : index
    %233 = vector.load %arg1[%c7_81, %c0_82, %c0_83] : memref<8x8x32xf32, #tpu.memory_space<vmem>>, vector<1x8x32xf32>
    %234 = vector.shape_cast %233 : vector<1x8x32xf32> to vector<8x32xf32>
    %235 = vector.broadcast %232 : vector<8x1xf32> to vector<8x32xf32>
    %236 = arith.mulf %235, %234 : vector<8x32xf32>
    %237 = arith.addf %230, %236 : vector<8x32xf32>
    %c64 = arith.constant 64 : index
    %c0_84 = arith.constant 0 : index
    %238 = vector.load %arg5[%c64, %c0_84] : memref<128x32xf32, #tpu.memory_space<vmem>>, vector<32x32xf32>
    %cst_85 = arith.constant dense<0.000000e+00> : vector<8x32xf32>
    %239 = tpu.matmul %237, %238, %cst_85 {dimension_numbers = #tpu.dot_dimension_numbers<[1], [0], [0], [1], [0, 0, 1, 1], [], []>} : vector<8x32xf32>, vector<32x32xf32>, vector<8x32xf32> -> vector<8x32xf32>
    %240 = arith.addf %182, %239 : vector<8x32xf32>
    %241 = vector.extract_strided_slice %64 {offsets = [0, 0, 3], sizes = [1, 8, 1], strides = [1, 1, 1]} : vector<8x8x4xf32> to vector<1x8x1xf32>
    %242 = vector.shape_cast %241 : vector<1x8x1xf32> to vector<8x1xf32>
    %c0_86 = arith.constant 0 : index
    %c0_87 = arith.constant 0 : index
    %c0_88 = arith.constant 0 : index
    %243 = vector.load %arg1[%c0_86, %c0_87, %c0_88] : memref<8x8x32xf32, #tpu.memory_space<vmem>>, vector<1x8x32xf32>
    %244 = vector.shape_cast %243 : vector<1x8x32xf32> to vector<8x32xf32>
    %245 = vector.broadcast %242 : vector<8x1xf32> to vector<8x32xf32>
    %246 = arith.mulf %245, %244 : vector<8x32xf32>
    %247 = vector.extract_strided_slice %64 {offsets = [1, 0, 3], sizes = [1, 8, 1], strides = [1, 1, 1]} : vector<8x8x4xf32> to vector<1x8x1xf32>
    %248 = vector.shape_cast %247 : vector<1x8x1xf32> to vector<8x1xf32>
    %c1_89 = arith.constant 1 : index
    %c0_90 = arith.constant 0 : index
    %c0_91 = arith.constant 0 : index
    %249 = vector.load %arg1[%c1_89, %c0_90, %c0_91] : memref<8x8x32xf32, #tpu.memory_space<vmem>>, vector<1x8x32xf32>
    %250 = vector.shape_cast %249 : vector<1x8x32xf32> to vector<8x32xf32>
    %251 = vector.broadcast %248 : vector<8x1xf32> to vector<8x32xf32>
    %252 = arith.mulf %251, %250 : vector<8x32xf32>
    %253 = arith.addf %246, %252 : vector<8x32xf32>
    %254 = vector.extract_strided_slice %64 {offsets = [2, 0, 3], sizes = [1, 8, 1], strides = [1, 1, 1]} : vector<8x8x4xf32> to vector<1x8x1xf32>
    %255 = vector.shape_cast %254 : vector<1x8x1xf32> to vector<8x1xf32>
    %c2_92 = arith.constant 2 : index
    %c0_93 = arith.constant 0 : index
    %c0_94 = arith.constant 0 : index
    %256 = vector.load %arg1[%c2_92, %c0_93, %c0_94] : memref<8x8x32xf32, #tpu.memory_space<vmem>>, vector<1x8x32xf32>
    %257 = vector.shape_cast %256 : vector<1x8x32xf32> to vector<8x32xf32>
    %258 = vector.broadcast %255 : vector<8x1xf32> to vector<8x32xf32>
    %259 = arith.mulf %258, %257 : vector<8x32xf32>
    %260 = arith.addf %253, %259 : vector<8x32xf32>
    %261 = vector.extract_strided_slice %64 {offsets = [3, 0, 3], sizes = [1, 8, 1], strides = [1, 1, 1]} : vector<8x8x4xf32> to vector<1x8x1xf32>
    %262 = vector.shape_cast %261 : vector<1x8x1xf32> to vector<8x1xf32>
    %c3_95 = arith.constant 3 : index
    %c0_96 = arith.constant 0 : index
    %c0_97 = arith.constant 0 : index
    %263 = vector.load %arg1[%c3_95, %c0_96, %c0_97] : memref<8x8x32xf32, #tpu.memory_space<vmem>>, vector<1x8x32xf32>
    %264 = vector.shape_cast %263 : vector<1x8x32xf32> to vector<8x32xf32>
    %265 = vector.broadcast %262 : vector<8x1xf32> to vector<8x32xf32>
    %266 = arith.mulf %265, %264 : vector<8x32xf32>
    %267 = arith.addf %260, %266 : vector<8x32xf32>
    %268 = vector.extract_strided_slice %64 {offsets = [4, 0, 3], sizes = [1, 8, 1], strides = [1, 1, 1]} : vector<8x8x4xf32> to vector<1x8x1xf32>
    %269 = vector.shape_cast %268 : vector<1x8x1xf32> to vector<8x1xf32>
    %c4_98 = arith.constant 4 : index
    %c0_99 = arith.constant 0 : index
    %c0_100 = arith.constant 0 : index
    %270 = vector.load %arg1[%c4_98, %c0_99, %c0_100] : memref<8x8x32xf32, #tpu.memory_space<vmem>>, vector<1x8x32xf32>
    %271 = vector.shape_cast %270 : vector<1x8x32xf32> to vector<8x32xf32>
    %272 = vector.broadcast %269 : vector<8x1xf32> to vector<8x32xf32>
    %273 = arith.mulf %272, %271 : vector<8x32xf32>
    %274 = arith.addf %267, %273 : vector<8x32xf32>
    %275 = vector.extract_strided_slice %64 {offsets = [5, 0, 3], sizes = [1, 8, 1], strides = [1, 1, 1]} : vector<8x8x4xf32> to vector<1x8x1xf32>
    %276 = vector.shape_cast %275 : vector<1x8x1xf32> to vector<8x1xf32>
    %c5_101 = arith.constant 5 : index
    %c0_102 = arith.constant 0 : index
    %c0_103 = arith.constant 0 : index
    %277 = vector.load %arg1[%c5_101, %c0_102, %c0_103] : memref<8x8x32xf32, #tpu.memory_space<vmem>>, vector<1x8x32xf32>
    %278 = vector.shape_cast %277 : vector<1x8x32xf32> to vector<8x32xf32>
    %279 = vector.broadcast %276 : vector<8x1xf32> to vector<8x32xf32>
    %280 = arith.mulf %279, %278 : vector<8x32xf32>
    %281 = arith.addf %274, %280 : vector<8x32xf32>
    %282 = vector.extract_strided_slice %64 {offsets = [6, 0, 3], sizes = [1, 8, 1], strides = [1, 1, 1]} : vector<8x8x4xf32> to vector<1x8x1xf32>
    %283 = vector.shape_cast %282 : vector<1x8x1xf32> to vector<8x1xf32>
    %c6_104 = arith.constant 6 : index
    %c0_105 = arith.constant 0 : index
    %c0_106 = arith.constant 0 : index
    %284 = vector.load %arg1[%c6_104, %c0_105, %c0_106] : memref<8x8x32xf32, #tpu.memory_space<vmem>>, vector<1x8x32xf32>
    %285 = vector.shape_cast %284 : vector<1x8x32xf32> to vector<8x32xf32>
    %286 = vector.broadcast %283 : vector<8x1xf32> to vector<8x32xf32>
    %287 = arith.mulf %286, %285 : vector<8x32xf32>
    %288 = arith.addf %281, %287 : vector<8x32xf32>
    %289 = vector.extract_strided_slice %64 {offsets = [7, 0, 3], sizes = [1, 8, 1], strides = [1, 1, 1]} : vector<8x8x4xf32> to vector<1x8x1xf32>
    %290 = vector.shape_cast %289 : vector<1x8x1xf32> to vector<8x1xf32>
    %c7_107 = arith.constant 7 : index
    %c0_108 = arith.constant 0 : index
    %c0_109 = arith.constant 0 : index
    %291 = vector.load %arg1[%c7_107, %c0_108, %c0_109] : memref<8x8x32xf32, #tpu.memory_space<vmem>>, vector<1x8x32xf32>
    %292 = vector.shape_cast %291 : vector<1x8x32xf32> to vector<8x32xf32>
    %293 = vector.broadcast %290 : vector<8x1xf32> to vector<8x32xf32>
    %294 = arith.mulf %293, %292 : vector<8x32xf32>
    %295 = arith.addf %288, %294 : vector<8x32xf32>
    %c96 = arith.constant 96 : index
    %c0_110 = arith.constant 0 : index
    %296 = vector.load %arg5[%c96, %c0_110] : memref<128x32xf32, #tpu.memory_space<vmem>>, vector<32x32xf32>
    %cst_111 = arith.constant dense<0.000000e+00> : vector<8x32xf32>
    %297 = tpu.matmul %295, %296, %cst_111 {dimension_numbers = #tpu.dot_dimension_numbers<[1], [0], [0], [1], [0, 0, 1, 1], [], []>} : vector<8x32xf32>, vector<32x32xf32>, vector<8x32xf32> -> vector<8x32xf32>
    %298 = arith.addf %240, %297 : vector<8x32xf32>
    %c0_112 = arith.constant 0 : index
    %c0_113 = arith.constant 0 : index
    %299 = vector.load %arg6[%c0_112, %c0_113] : memref<1x32xf32, #tpu.memory_space<vmem>>, vector<1x32xf32>
    %300 = vector.broadcast %299 : vector<1x32xf32> to vector<8x32xf32>
    %301 = arith.addf %298, %300 : vector<8x32xf32>
    %302 = math.tanh %301 : vector<8x32xf32>
    %c0_114 = arith.constant 0 : index
    %c0_115 = arith.constant 0 : index
    %303 = vector.load %arg7[%c0_114, %c0_115] : memref<32x2xf32, #tpu.memory_space<vmem>>, vector<32x2xf32>
    %cst_116 = arith.constant dense<0.000000e+00> : vector<8x2xf32>
    %304 = tpu.matmul %302, %303, %cst_116 {dimension_numbers = #tpu.dot_dimension_numbers<[1], [0], [0], [1], [0, 0, 1, 1], [], []>} : vector<8x32xf32>, vector<32x2xf32>, vector<8x2xf32> -> vector<8x2xf32>
    %c0_117 = arith.constant 0 : index
    %c0_118 = arith.constant 0 : index
    %305 = vector.load %arg8[%c0_117, %c0_118] : memref<1x2xf32, #tpu.memory_space<vmem>>, vector<1x2xf32>
    %306 = vector.broadcast %305 : vector<1x2xf32> to vector<8x2xf32>
    %307 = arith.addf %304, %306 : vector<8x2xf32>
    %c0_119 = arith.constant 0 : index
    %c0_120 = arith.constant 0 : index
    %308 = vector.load %arg9[%c0_119, %c0_120] : memref<8x2xf32, #tpu.memory_space<vmem>>, vector<8x2xf32>
    tpu.vector_store %arg9[%c0_119, %c0_120], %307 {strides = array<i32>} : memref<8x2xf32, #tpu.memory_space<vmem>>, vector<8x2xf32>,
    return
  }
  func.func @transform_0(%arg0: i32) -> (i32, i32, i32) {
    %c0_i32 = arith.constant 0 : i32
    %c0_i32_0 = arith.constant 0 : i32
    %c0_i32_1 = arith.constant 0 : i32
    return %c0_i32, %arg0, %c0_i32_0 : i32, i32, i32
  }
  func.func @transform_1(%arg0: i32) -> (i32, i32, i32) {
    %c0_i32 = arith.constant 0 : i32
    %c0_i32_0 = arith.constant 0 : i32
    %c0_i32_1 = arith.constant 0 : i32
    return %c0_i32, %arg0, %c0_i32_0 : i32, i32, i32
  }
  func.func @transform_2(%arg0: i32) -> (i32, i32) {
    %c0_i32 = arith.constant 0 : i32
    %c0_i32_0 = arith.constant 0 : i32
    %c0_i32_1 = arith.constant 0 : i32
    return %c0_i32, %c0_i32_0 : i32, i32
  }
  func.func @transform_3(%arg0: i32) -> (i32, i32) {
    %c0_i32 = arith.constant 0 : i32
    %c0_i32_0 = arith.constant 0 : i32
    %c0_i32_1 = arith.constant 0 : i32
    return %c0_i32, %c0_i32_0 : i32, i32
  }
  func.func @transform_4(%arg0: i32) -> (i32, i32) {
    %c0_i32 = arith.constant 0 : i32
    %c0_i32_0 = arith.constant 0 : i32
    %c0_i32_1 = arith.constant 0 : i32
    return %c0_i32, %c0_i32_0 : i32, i32
  }
  func.func @transform_5(%arg0: i32) -> (i32, i32) {
    %c0_i32 = arith.constant 0 : i32
    %c0_i32_0 = arith.constant 0 : i32
    %c0_i32_1 = arith.constant 0 : i32
    return %c0_i32, %c0_i32_0 : i32, i32
  }
  func.func @transform_6(%arg0: i32) -> (i32, i32) {
    %c0_i32 = arith.constant 0 : i32
    %c0_i32_0 = arith.constant 0 : i32
    %c0_i32_1 = arith.constant 0 : i32
    return %c0_i32, %c0_i32_0 : i32, i32
  }
  func.func @transform_7(%arg0: i32) -> (i32, i32) {
    %c0_i32 = arith.constant 0 : i32
    %c0_i32_0 = arith.constant 0 : i32
    %c0_i32_1 = arith.constant 0 : i32
    return %c0_i32, %c0_i32_0 : i32, i32
  }
  func.func @transform_8(%arg0: i32) -> (i32, i32) {
    %c0_i32 = arith.constant 0 : i32
    %c0_i32_0 = arith.constant 0 : i32
    return %arg0, %c0_i32 : i32, i32
  }
  func.func @transform_9(%arg0: i32) -> (i32, i32, i32) {
    %c0_i32 = arith.constant 0 : i32
    %c0_i32_0 = arith.constant 0 : i32
    %c0_i32_1 = arith.constant 0 : i32
    return %c0_i32, %arg0, %c0_i32_0 : i32, i32, i32
  }
}

</mosaic_0001>

<bundles_post_ra>
// kernel: classifier_forward.1
= control target key start
LH: loop header
LB: loop body
LE: loop exit
PB: predicated region body
PF: predicated region fallthrough
CT: control target
= control target key end

     0   :  { %s1506_s30 = smov 0   ;;  %s1508_s10 = smov 0   ;;  %s1811_s0 = inlined_call_operand.vmem [shape: f32[8,24,32], index: 0, kind: input, shape index: {}]   ;;  %s1812_s1 = inlined_call_operand.vmem [shape: f32[8,24,1], index: 1, kind: input, shape index: {}]   ;;  %s1813_s2 = inlined_call_operand.vmem [shape: f32[32,16], index: 2, kind: input, shape index: {}]   ;;  %s1814_s3 = inlined_call_operand.vmem [shape: f32[16,4], index: 3, kind: input, shape index: {}]   ;;  %s1815_s4 = inlined_call_operand.vmem [shape: f32[128,32], index: 4, kind: input, shape index: {}]   ;;  %s1816_s5 = inlined_call_operand.vmem [shape: f32[1,32], index: 5, kind: input, shape index: {}]   ;;  %s1817_s6 = inlined_call_operand.vmem [shape: f32[32,2], index: 6, kind: input, shape index: {}]   ;;  %s1818_s7 = inlined_call_operand.vmem [shape: f32[1,2], index: 7, kind: input, shape index: {}]   ;;  %s1819_s8 = inlined_call_operand.vmem [shape: f32[24,2], index: 8, kind: output, shape index: {0}]   ;;  %s1820_s9 = inlined_call_operand.vmem [shape: f32[8,24,4], index: 9, kind: output, shape index: {1}]  }
   0x1   :  { %s1510_s11 = smov 0  }
   0x2 LB: > { %s1522_s12 = sadd.s32 4294967295, %s1450_s11   ;;  %s1525_s13 = sadd.s32 1, %s1450_s11   ;;  %s1450_s11 = sphi %s1510_s11, %s1825_s11   ;;  %s1446_s10 = sphi %s1508_s10, %s1824_s10   ;;  %s1442_s30 = sphi %s1506_s30, %s1823_s30  }
   0x3   : > { %s24_s14 = ssub.s32 %s1450_s11, %s1525_s13  ;;  %s27_s15 = sadd.s32 1, %s1446_s10 }
   0x4   : > { %p25_p0 = scmp.eq.s32.totalorder %s24_s14, 0  ;;  %p34_p1 = scmp.ne.s32.totalorder %s1446_s10, %s1442_s30 }
   0x5   : > { %p35_p2 = scmp.eq.s32.totalorder %s1450_s11, 0  ;;  %p242_p3 = scmp.eq.s32.totalorder %s1522_s12, 2 }
   0x6   : > { %s1535_s16 = scalar_select %p25_p0, %s1446_s10, %s27_s15  }
   0x7   : > { %p1537_p4 = por %p35_p2, %p34_p1  ;;  %p1541_p5 = por %p242_p3, %p34_p1 }
   0x8   : > { %p1288_p6 = scmp.ge.s32.totalorder %s1450_s11, 3 }
   0xa   : > { %282 = sbr.rel (%p1288_p6) target bundleno = 39 (0x27), region = 40 }
   0xf   : > { %285 = sbr.rel (!%p1537_p4) target bundleno = 27 (0x1b), region = 44  ;;  %s287_s19 = sand.u32 (%p1537_p4), 1, %s1446_s10  }
  0x10   : > { %s1290_s20 = sshll.u32 (%p1537_p4), %s1450_s11, 3  ;;  %s1289_s21 = sshll.u32 (%p1537_p4), %s287_s19, 6 }
  0x11   : > { %s291_s24 = scalar_lea.vmem (%p1537_p4), %s1811_s0, %s1290_s20  ;;  %s289_s25 = scalar_lea.vmem (%p1537_p4), [#allocation2], %s1289_s21 }
  0x12   : > { %v334_v0 = vld [vmem:[%s291_s24] sm:$0xff] (%p1537_p4)  ;;  %v336_v1 = vld [vmem:[%s291_s24 + $0x18] sm:$0xff] (%p1537_p4)  ;;  %v338_v2 = vld [vmem:[%s291_s24 + $0x30] sm:$0xff] (%p1537_p4) }
  0x13   : > { %335 = vst [vmem:[%s289_s25] sm:$0xff] (%p1537_p4), %v334_v0  ;;  %v340_v3 = vld [vmem:[%s291_s24 + $0x48] sm:$0xff] (%p1537_p4)  ;;  %v342_v4 = vld [vmem:[%s291_s24 + $0x60] sm:$0xff] (%p1537_p4)  ;;  %v344_v5 = vld [vmem:[%s291_s24 + $0x78] sm:$0xff] (%p1537_p4) }
  0x14   : > { %337 = vst [vmem:[%s289_s25 + $0x8] sm:$0xff] %v336_v1  ;;  %v346_v6 = vld [vmem:[%s291_s24 + $0x90] sm:$0xff]  ;;  %v348_v7 = vld [vmem:[%s291_s24 + $0xa8] sm:$0xff] }
  0x15   : > { %339 = vst [vmem:[%s289_s25 + $0x10] sm:$0xff] %v338_v2 }
  0x16   : > { %341 = vst [vmem:[%s289_s25 + $0x18] sm:$0xff] %v340_v3 }
  0x17   : > { %343 = vst [vmem:[%s289_s25 + $0x20] sm:$0xff] %v342_v4 }
  0x18   : > { %345 = vst [vmem:[%s289_s25 + $0x28] sm:$0xff] %v344_v5 }
  0x19   : > { %347 = vst [vmem:[%s289_s25 + $0x30] sm:$0xff] %v346_v6 }
  0x1a   : > { %349 = vst [vmem:[%s289_s25 + $0x38] sm:$0xff] %v348_v7 }
  0x1b PF: > { %355 = sbr.rel (!%p1537_p4) target bundleno = 39 (0x27), region = 82  ;;  %s357_s26 = sand.u32 (%p1537_p4), 1, %s1446_s10  }
  0x1c   : > { %s1292_s27 = sshll.u32 (%p1537_p4), %s1450_s11, 3  ;;  %s1291_s28 = sshll.u32 (%p1537_p4), %s357_s26, 6 }
  0x1d   : > { %s361_s15 = scalar_lea.vmem (%p1537_p4), %s1812_s1, %s1292_s27  ;;  %s359_s19 = scalar_lea.vmem (%p1537_p4), [#allocation3], %s1291_s28 }
  0x1e   : > { %v404_v8 = vld [vmem:[%s361_s15] sm:$0xff] (%p1537_p4)  ;;  %v406_v9 = vld [vmem:[%s361_s15 + $0x18] sm:$0xff] (%p1537_p4)  ;;  %v408_v10 = vld [vmem:[%s361_s15 + $0x30] sm:$0xff] (%p1537_p4) }
  0x1f   : > { %405 = vst [vmem:[%s359_s19] sm:$0xff] (%p1537_p4), %v404_v8  ;;  %v410_v11 = vld [vmem:[%s361_s15 + $0x48] sm:$0xff] (%p1537_p4)  ;;  %v412_v12 = vld [vmem:[%s361_s15 + $0x60] sm:$0xff] (%p1537_p4)  ;;  %v414_v13 = vld [vmem:[%s361_s15 + $0x78] sm:$0xff] (%p1537_p4) }
  0x20   : > { %407 = vst [vmem:[%s359_s19 + $0x8] sm:$0xff] %v406_v9  ;;  %v416_v14 = vld [vmem:[%s361_s15 + $0x90] sm:$0xff]  ;;  %v418_v15 = vld [vmem:[%s361_s15 + $0xa8] sm:$0xff] }
  0x21   : > { %409 = vst [vmem:[%s359_s19 + $0x10] sm:$0xff] %v408_v10 }
  0x22   : > { %411 = vst [vmem:[%s359_s19 + $0x18] sm:$0xff] %v410_v11 }
  0x23   : > { %413 = vst [vmem:[%s359_s19 + $0x20] sm:$0xff] %v412_v12 }
  0x24   : > { %415 = vst [vmem:[%s359_s19 + $0x28] sm:$0xff] %v414_v13 }
  0x25   : > { %417 = vst [vmem:[%s359_s19 + $0x30] sm:$0xff] %v416_v14 }
  0x26   : > { %419 = vst [vmem:[%s359_s19 + $0x38] sm:$0xff] %v418_v15 }
  0x27 PF: > { %p1293_p7 = scmp.ge.s32.totalorder %s1450_s11, 1  ;;  %p424_p8 = scmp.lt.s32.totalorder %s1450_s11, 4 }
  0x29   : > { %p425_p9 = pnand %p1293_p7, %p424_p8 }
  0x2a   : > { %s431_s23 = sand.u32 (!%p425_p9), 1, %s1442_s30   ;;  %p480_p10 = scmp.lt.s32.totalorder (!%p425_p9), %s1522_s12, 2 }
  0x2b   : > { %428 = sbr.rel (%p425_p9) target bundleno = 893 (0x37d), region = 120  ;;  %s1569_s24 = sshll.u32 (!%p425_p9), %s431_s23, 6 }
  0x2c   : > { %s433_s28 = scalar_lea.vmem (!%p425_p9), [#allocation2], %s1569_s24  ;;  %s1617_s19 = scalar_lea.vmem (!%p425_p9), [#allocation3], %s1569_s24 }
  0x2d   : > { %s1643_s17 = scalar_lea.vmem (!%p425_p9), [#allocation4], %s1569_s24 }
  0x30   : > { %v495_v16 = vld [vmem:[%s1813_s2 + $0x18] sm:$0xff]  ;;  %v494_v17 = vld [vmem:[%s1813_s2 + $0x10] sm:$0xff]  ;;  %v493_v18 = vld [vmem:[%s1813_s2 + $0x8] sm:$0xff]  ;;  %vm496_vm0 = vcmask 261120   ;;  %v1452_v31 = vmov 0   ;;  %vm572_vm1 = vcmask 130048  }
  0x31   : > { %533 = vmatpush.msra.mxu0 %v495_v16  ;;  %1330 = vmatpush.msra.mxu3 %v495_v16  ;;  %v492_v19 = vld [vmem:[%s1813_s2] sm:$0xff]  ;;  %v1580_v21 = vld [vmem:[%s433_s28 + $0x28] sm:$0xff]  ;;  %v1588_v23 = vld [vmem:[%s433_s28 + $0x30] sm:$0xff]  ;;  %vm741_vm2 = vcmask 31744   ;;  %s481_s14 = scalar_select %p480_p10, %s1522_s12, 2  ;;  %vm1108_vm3 = vcmask 15360  }
  0x32   : > { %v1578_v20 = vld [vmem:[%s433_s28] sm:$0xff]  ;;  %v1586_v22 = vld [vmem:[%s433_s28 + $0x8] sm:$0xff]  ;;  %v1594_v24 = vld [vmem:[%s433_s28 + $0x10] sm:$0xff]  ;;  %1364 = vset.pattern.permute.xlu0 %v1452_v31  ;;  %1365 = vset.pattern.permute.xlu1 %v1452_v31  ;;  %s1327_s24 = sshll.u32 (%p1541_p5), %s1522_s12, 3 }
  0x33   : > { %534 = vmatpush.msra.mxu0 %v494_v17  ;;  %1331 = vmatpush.msra.mxu3 %v494_v17  ;;  %v1596_v25 = vld [vmem:[%s433_s28 + $0x38] sm:$0xff]  ;;  %v1606_v27 = vld [vmem:[%s433_s28 + $0x20] sm:$0xff]  ;;  %v571_v28 = vld [vmem:[%s1814_s3 + $0x8] sm:$0xff]  ;;  %s1297_s15 = sshll.u32 %s481_s14, 3  ;;  %s1125_s11 = scalar_lea.vmem (%p1541_p5), %s1820_s9, %s1327_s24 }
  0x34   : > { %v1602_v26 = vld [vmem:[%s433_s28 + $0x18] sm:$0xff]  ;;  %611 = vmatpush.msra.mxu1 %v571_v28  ;;  %1334 = vmatpush.msra.mxu2 %v571_v28  ;;  %v570_v29 = vld [vmem:[%s1814_s3] sm:$0xff]  ;;  %v639_v32 = vld [vmem:[%s1617_s19 + $0x8] sm:$0xff]  ;;  %s483_s23 = scalar_lea.vmem %s1819_s8, %s1297_s15 }
  0x35   : > { %535 = vmatpush.msra.mxu0 %v493_v18  ;;  %1332 = vmatpush.msra.mxu3 %v493_v18  ;;  %v638_v30 = vld [vmem:[%s1617_s19] sm:$0xff]  ;;  %v640_v33 = vld [vmem:[%s1617_s19 + $0x10] sm:$0xff]  ;;  %v641_v35 = vld [vmem:[%s1617_s19 + $0x18] sm:$0xff] }
  0x36   : > { %612 = vmatpush.msra.mxu1 %v570_v29  ;;  %1335 = vmatpush.msra.mxu2 %v570_v29  ;;  %v644_v39 = vld [vmem:[%s1617_s19 + $0x30] sm:$0xff]  ;;  %v645_v40 = vld [vmem:[%s1617_s19 + $0x38] sm:$0xff]  ;;  %v642_v44 = vld [vmem:[%s1617_s19 + $0x20] sm:$0xff] }
  0x37   : > { %536 = vmatpush.msra.mxu0 %v492_v19  ;;  %1333 = vmatpush.msra.mxu3 %v492_v19  ;;  %v643_v47 = vld [vmem:[%s1617_s19 + $0x28] sm:$0xff] }
  0x38   : > { %1298 = vmatmul.msk.f32.vlgmr.msra.gmra.mxu0 %vm496_vm0, %v1578_v20  ;;  %1303 = vmatmul.msk.f32.vlgmr.msra.gmra.mxu3 %vm496_vm0, %v1580_v21 }
  0x39   : > { %648 = vperm.xlu0 %1364, %v638_v30   ;;  %1366 = vset.pattern.permute.xlu2 %v1452_v31 }
  0x3a   : > { %658 = vperm.xlu1 %1365, %v640_v33   ;;  %668 = vperm.xlu2 %1366, %v642_v44  }
  0x40   : > { %1299 = vmatmul.msk.f32.gmra.mxu0 %vm496_vm0, %v1586_v22  ;;  %1304 = vmatmul.msk.f32.gmra.mxu3 %vm496_vm0, %v1588_v23 }
  0x41   : > { %653 = vperm.xlu0 %1364, %v639_v32  }
  0x42   : > { %663 = vperm.xlu1 %1365, %v641_v35   ;;  %673 = vperm.xlu2 %1366, %v643_v47  }
  0x48   : > { %1300 = vmatmul.msk.f32.gmra.mxu0 %vm496_vm0, %v1594_v24  ;;  %1305 = vmatmul.msk.f32.gmra.mxu3 %vm496_vm0, %v1596_v25 }
  0x49   : > { %678 = vperm.xlu0 %1364, %v644_v39  }
  0x4a   : > { %683 = vperm.xlu1 %1365, %v645_v40  }
  0x50   : > { %1301 = vmatmul.msk.f32.gmra.mxu0 %vm496_vm0, %v1602_v26 }
  0x58   : > { %1302 = vmatmul.msk.f32.gmra.mxu0 %vm496_vm0, %v1606_v27 }
  0x94   : > { %v669_v62 = vpop.permute.xlu2 %668 }
  0x9c   : > { %v674_v11 = vpop.permute.xlu2 %673 }
  0xab   : > { %v649_v58 = vpop.permute.xlu0 %648 }
  0xac   : > { %v659_v59 = vpop.permute.xlu1 %658 }
  0xb3   : > { %v654_v61 = vpop.permute.xlu0 %653 }
  0xb4   : > { %v664_v0 = vpop.permute.xlu1 %663 }
  0xb5   : > { %v538_v34 = vpop.f32.mrf.mxu0 }
  0xb6   : > { %1392 = vtanh.f32 %v538_v34 }
  0xbb   : > { %v553_v36 = vpop.f32.mrf.mxu3  ;;  %v679_v9 = vpop.permute.xlu0 %678 }
  0xbc   : > { %v1393_v37 = vpop.eup %1392  ;;  %v684_v15 = vpop.permute.xlu1 %683 }
  0xbd   : > { %v541_v38 = vpop.f32.mrf.mxu0  ;;  %1306 = vmatmul.msk.f32.vlgmr.msra.gmra.mxu1 %vm572_vm1, %v1393_v37 }
  0xbe   : > { %1394 = vtanh.f32 %v541_v38 }
  0xc3   : > { %v556_v41 = vpop.f32.mrf.mxu3 }
  0xc4   : > { %v1395_v42 = vpop.eup %1394  ;;  %1396 = vtanh.f32 %v556_v41  ;;  %v1453_v41 = vmov 1  }
  0xc5   : > { %v544_v43 = vpop.f32.mrf.mxu0  ;;  %1307 = vmatmul.msk.f32.gmra.mxu1 %vm572_vm1, %v1395_v42  ;;  %1367 = vset.pattern.permute.xlu2 %v1453_v41 }
  0xc6   : > { %1398 = vtanh.f32 %v544_v43  ;;  %1368 = vset.pattern.permute.xlu0 %v1453_v41 }
  0xca   : > { %v1397_v45 = vpop.eup %1396 }
  0xcb   : > { %v559_v46 = vpop.f32.mrf.mxu3  ;;  %1312 = vmatmul.msk.f32.vlgmr.msra.gmra.mxu2 %vm572_vm1, %v1397_v45 }
  0xcc   : > { %v1399_v48 = vpop.eup %1398  ;;  %1400 = vtanh.f32 %v559_v46 }
  0xcd   : > { %v547_v49 = vpop.f32.mrf.mxu0  ;;  %1308 = vmatmul.msk.f32.gmra.mxu1 %vm572_vm1, %v1399_v48 }
  0xce   : > { %1402 = vtanh.f32 %v547_v49 }
  0xd2   : > { %v1401_v50 = vpop.eup %1400 }
  0xd3   : > { %1313 = vmatmul.msk.f32.gmra.mxu2 %vm572_vm1, %v1401_v50 }
  0xd4   : > { %v1403_v51 = vpop.eup %1402 }
  0xd5   : > { %v550_v52 = vpop.f32.mrf.mxu0  ;;  %1309 = vmatmul.msk.f32.gmra.mxu1 %vm572_vm1, %v1403_v51 }
  0xd6   : > { %1404 = vtanh.f32 %v550_v52 }
  0xd7   : > { %1406 = vtanh.f32 %v553_v36 }
  0xdc   : > { %v1405_v53 = vpop.eup %1404 }
  0xdd   : > { %1310 = vmatmul.msk.f32.gmra.mxu1 %vm572_vm1, %v1405_v53  ;;  %v1407_v54 = vpop.eup %1406 }
  0xe5   : > { %1311 = vmatmul.msk.f32.gmra.mxu1 %vm572_vm1, %v1407_v54 }
 0x13a   : > { %v614_v55 = vpop.f32.mrf.mxu1 }
 0x13b   : > { %v686_v3 = vadd.f32 %v649_v58, %v614_v55 }
 0x142   : > { %v617_v56 = vpop.f32.mrf.mxu1 }
 0x143   : > { %v687_v63 = vadd.f32 %v654_v61, %v617_v56 }
 0x145   : > { %v694_v5 = vmax.f32 %v686_v3, %v687_v63 }
 0x14a   : > { %v620_v57 = vpop.f32.mrf.mxu1 }
 0x14b   : > { %v688_v4 = vadd.f32 %v659_v59, %v620_v57 }
 0x14d   : > { %v695_v7 = vmax.f32 %v694_v5, %v688_v4 }
 0x14e   : > { %v632_v1 = vpop.f32.mrf.mxu2 }
 0x14f   : > { %v692_v17 = vadd.f32 %v679_v9, %v632_v1  ;;  %v1455_v9 = vmov 3  }
 0x152   : > { %v623_v60 = vpop.f32.mrf.mxu1 }
 0x153   : > { %v689_v6 = vadd.f32 %v664_v0, %v623_v60 }
 0x155   : > { %v696_v10 = vmax.f32 %v695_v7, %v689_v6 }
 0x156   : > { %v635_v16 = vpop.f32.mrf.mxu2 }
 0x157   : > { %v693_v19 = vadd.f32 %v684_v15, %v635_v16 }
 0x15a   : > { %v626_v2 = vpop.f32.mrf.mxu1 }
 0x15b   : > { %v690_v8 = vadd.f32 %v669_v62, %v626_v2 }
 0x15d   : > { %v697_v13 = vmax.f32 %v696_v10, %v690_v8 }
 0x162   : > { %v629_v12 = vpop.f32.mrf.mxu1 }
 0x163   : > { %v691_v14 = vadd.f32 %v674_v11, %v629_v12  ;;  %v874_v12 = vld [vmem:[%s1815_s4 + $0x38] sm:$0xff] }
 0x164   : > { %890 = vmatpush.msrb.mxu2 %v874_v12 }
 0x165   : > { %v698_v18 = vmax.f32 %v697_v13, %v691_v14  ;;  %v873_v13 = vld [vmem:[%s1815_s4 + $0x30] sm:$0xff] }
 0x166   : > { %891 = vmatpush.msrb.mxu2 %v873_v13  ;;  %v971_v13 = vld [vmem:[%s1815_s4 + $0x58] sm:$0xff] }
 0x167   : > { %v699_v28 = vmax.f32 %v698_v18, %v692_v17 }
 0x169   : > { %v700_v29 = vmax.f32 %v699_v28, %v693_v19 }
 0x16b   : > { %v701_v30 = vsub.f32 %v686_v3, %v700_v29  ;;  %v702_v32 = vsub.f32 %v687_v63, %v700_v29  ;;  %v703_v33 = vsub.f32 %v688_v4, %v700_v29  ;;  %v704_v34 = vsub.f32 %v689_v6, %v700_v29 }
 0x16c   : > { %v705_v37 = vsub.f32 %v690_v8, %v700_v29  ;;  %v706_v39 = vsub.f32 %v691_v14, %v700_v29  ;;  %v707_v42 = vsub.f32 %v692_v17, %v700_v29  ;;  %v708_v44 = vsub.f32 %v693_v19, %v700_v29  ;;  %v872_v17 = vld [vmem:[%s1815_s4 + $0x28] sm:$0xff]  ;;  %v871_v19 = vld [vmem:[%s1815_s4 + $0x20] sm:$0xff]  ;;  %v823_v29 = vld [vmem:[%s1815_s4 + $0x18] sm:$0xff] }
 0x16d   : > { %v709_v35 = vmul.f32 1.442695, %v701_v30  ;;  %v711_v36 = vmul.f32 1.442695, %v702_v32  ;;  %v713_v38 = vmul.f32 1.442695, %v703_v33  ;;  %892 = vmatpush.msrb.mxu2 %v872_v17  ;;  %913 = vmatpush.msrb.mxu3 %v823_v29 }
 0x16e   : > { %v715_v40 = vmul.f32 1.442695, %v704_v34  ;;  %v717_v43 = vmul.f32 1.442695, %v705_v37  ;;  %v719_v45 = vmul.f32 1.442695, %v706_v39 }
 0x16f   : > { %1408 = vpow2.f32 %v709_v35  ;;  %v721_v48 = vmul.f32 1.442695, %v707_v42  ;;  %v723_v51 = vmul.f32 1.442695, %v708_v44  ;;  %v1454_v8 = vmov 2   ;;  %893 = vmatpush.msrb.mxu2 %v871_v19  ;;  %v822_v30 = vld [vmem:[%s1815_s4 + $0x10] sm:$0xff] }
 0x170   : > { %1410 = vpow2.f32 %v711_v36  ;;  %914 = vmatpush.msrb.mxu3 %v822_v30  ;;  %v821_v34 = vld [vmem:[%s1815_s4 + $0x8] sm:$0xff]  ;;  %v820_v35 = vld [vmem:[%s1815_s4] sm:$0xff]  ;;  %v1046_v17 = vld [vmem:[%s1815_s4 + $0x78] sm:$0xff] }
 0x171   : > { %1412 = vpow2.f32 %v713_v38  ;;  %987 = vmatpush.msra.mxu2 %v971_v13  ;;  %v1044_v29 = vld [vmem:[%s1815_s4 + $0x68] sm:$0xff] }
 0x172   : > { %1414 = vpow2.f32 %v715_v40  ;;  %915 = vmatpush.msrb.mxu3 %v821_v34 }
 0x173   : > { %1416 = vpow2.f32 %v717_v43 }
 0x174   : > { %1418 = vpow2.f32 %v719_v45  ;;  %916 = vmatpush.msrb.mxu3 %v820_v35  ;;  %v1043_v35 = vld [vmem:[%s1815_s4 + $0x60] sm:$0xff] }
 0x175   : > { %v1409_v46 = vpop.eup %1408  ;;  %1420 = vpow2.f32 %v721_v48 }
 0x176   : > { %v1411_v47 = vpop.eup %1410  ;;  %1422 = vpow2.f32 %v723_v51  ;;  %1062 = vmatpush.msra.mxu3 %v1046_v17 }
 0x177   : > { %v725_v49 = vadd.f32 %v1411_v47, %v1409_v46  ;;  %v1413_v50 = vpop.eup %1412 }
 0x178   : > { %v1415_v53 = vpop.eup %1414 }
 0x179   : > { %v726_v52 = vadd.f32 %v1413_v50, %v725_v49  ;;  %v1417_v55 = vpop.eup %1416 }
 0x17a   : > { %v1419_v57 = vpop.eup %1418 }
 0x17b   : > { %v727_v54 = vadd.f32 %v1415_v53, %v726_v52  ;;  %v1421_v59 = vpop.eup %1420 }
 0x17c   : > { %v1423_v61 = vpop.eup %1422 }
 0x17d   : > { %v728_v56 = vadd.f32 %v1417_v55, %v727_v54 }
 0x17f   : > { %v729_v58 = vadd.f32 %v1419_v57, %v728_v56 }
 0x181   : > { %v730_v60 = vadd.f32 %v1421_v59, %v729_v58 }
 0x183   : > { %v731_v62 = vadd.f32 %v1423_v61, %v730_v60 }
 0x185   : > { %1424 = vrcp.f32 %v731_v62 }
 0x18b   : > { %v1425_v63 = vpop.eup %1424 }
 0x18c   : > { %v1640_v0 = vmul.f32 %v1425_v63, %v1419_v57  ;;  %v734_v1 = vmul.f32 %v1425_v63, %v1411_v47  ;;  %v733_v2 = vmul.f32 %v1425_v63, %v1409_v46  ;;  %v736_v3 = vmul.f32 %v1425_v63, %v1415_v53 }
 0x18d   : > { %v735_v4 = vmul.f32 %v1425_v63, %v1413_v50  ;;  %v737_v5 = vmul.f32 %v1425_v63, %v1417_v55  ;;  %v739_v6 = vmul.f32 %v1425_v63, %v1421_v59  ;;  %v740_v7 = vmul.f32 %v1425_v63, %v1423_v61 }
 0x18e   : > { %747 = vst.msk [vmem:[%s1643_s17 + $0x28] sm:$0xff] %vm741_vm2, %v1640_v0  ;;  %830 = vperm.xlu0 %1368, %v734_v1   ;;  %753 = vperm.xlu1 %1365, %v733_v2  }
 0x18f   : > { %743 = vst.msk [vmem:[%s1643_s17 + $0x8] sm:$0xff] %vm741_vm2, %v734_v1  ;;  %825 = vperm.xlu2 %1367, %v733_v2  }
 0x190   : > { %742 = vst.msk [vmem:[%s1643_s17] sm:$0xff] %vm741_vm2, %v733_v2 }
 0x191   : > { %745 = vst.msk [vmem:[%s1643_s17 + $0x18] sm:$0xff] %vm741_vm2, %v736_v3 }
 0x192   : > { %744 = vst.msk [vmem:[%s1643_s17 + $0x10] sm:$0xff] %vm741_vm2, %v735_v4 }
 0x193   : > { %746 = vst.msk [vmem:[%s1643_s17 + $0x20] sm:$0xff] %vm741_vm2, %v737_v5 }
 0x194   : > { %748 = vst.msk [vmem:[%s1643_s17 + $0x30] sm:$0xff] %vm741_vm2, %v739_v6 }
 0x195   : > { %749 = vst.msk [vmem:[%s1643_s17 + $0x38] sm:$0xff] %vm741_vm2, %v740_v7 }
 0x196   : > { %842 = vperm.xlu0 %1368, %v736_v3   ;;  %1370 = vset.pattern.permute.xlu1 %v1453_v41 }
 0x197   : > { %1369 = vset.pattern.permute.xlu2 %v1452_v31  ;;  %836 = vperm.xlu1 %1370, %v735_v4  }
 0x198   : > { %761 = vperm.xlu2 %1369, %v734_v1   ;;  %v1174_v17 = vld [vmem:[%s1643_s17 + $0x18] sm:$0xff] (%p1541_p5) }
 0x199   : > { %1175 = vst [vmem:[%s1125_s11 + $0x48] sm:$0xff] (%p1541_p5), %v1174_v17 }
 0x19e   : > { %1373 = vset.pattern.permute.xlu0 %v1452_v31 }
 0x19f   : > { %788 = vperm.xlu0 %1373, %v737_v5   ;;  %1371 = vset.pattern.permute.xlu1 %v1452_v31 }
 0x1a0   : > { %770 = vperm.xlu2 %1369, %v735_v4   ;;  %779 = vperm.xlu1 %1371, %v736_v3  }
 0x1a7   : > { %1378 = vset.pattern.permute.xlu0 %v1453_v41 }
 0x1a8   : > { %1372 = vset.pattern.permute.xlu2 %v1453_v41  ;;  %860 = vperm.xlu0 %1378, %v739_v6  }
 0x1a9   : > { %1374 = vset.pattern.permute.xlu1 %v1453_v41  ;;  %848 = vperm.xlu2 %1372, %v737_v5  }
 0x1aa   : > { %854 = vperm.xlu1 %1374, %v1640_v0  }
 0x1b0   : > { %866 = vperm.xlu0 %1378, %v740_v7  }
 0x1b1   : > { %1375 = vset.pattern.permute.xlu2 %v1454_v8 }
 0x1b2   : > { %1376 = vset.pattern.permute.xlu1 %v1454_v8  ;;  %922 = vperm.xlu2 %1375, %v733_v2  }
 0x1b3   : > { %927 = vperm.xlu1 %1376, %v734_v1  }
 0x1b8   : > { %1384 = vset.pattern.permute.xlu0 %v1452_v31 }
 0x1b9   : > { %815 = vperm.xlu0 %1384, %v740_v7  }
 0x1ba   : > { %1377 = vset.pattern.permute.xlu2 %v1452_v31 }
 0x1bb   : > { %933 = vperm.xlu1 %1376, %v735_v4   ;;  %797 = vperm.xlu2 %1377, %v1640_v0  }
 0x1c1   : > { %1385 = vset.pattern.permute.xlu0 %v1454_v8 }
 0x1c2   : > { %957 = vperm.xlu0 %1385, %v739_v6  }
 0x1c3   : > { %1380 = vset.pattern.permute.xlu1 %v1455_v9  ;;  %1379 = vset.pattern.permute.xlu2 %v1455_v9 }
 0x1c4   : > { %1002 = vperm.xlu1 %1380, %v734_v1   ;;  %997 = vperm.xlu2 %1379, %v733_v2  }
 0x1ca   : > { %1389 = vset.pattern.permute.xlu0 %v1455_v9 }
 0x1cc   : > { %1382 = vset.pattern.permute.xlu1 %v1454_v8  ;;  %1381 = vset.pattern.permute.xlu2 %v1452_v31 }
 0x1cd   : > { %939 = vperm.xlu1 %1382, %v736_v3   ;;  %806 = vperm.xlu2 %1381, %v739_v6  }
 0x1d5   : > { %945 = vperm.xlu1 %1382, %v737_v5   ;;  %1383 = vset.pattern.permute.xlu2 %v1455_v9 }
 0x1d6   : > { %1008 = vperm.xlu2 %1383, %v735_v4  }
 0x1dd   : > { %951 = vperm.xlu1 %1382, %v1640_v0  }
 0x1de   : > { %1014 = vperm.xlu2 %1383, %v736_v3  }
 0x1e5   : > { %1386 = vset.pattern.permute.xlu1 %v1455_v9 }
 0x1e6   : > { %1026 = vperm.xlu1 %1386, %v1640_v0   ;;  %1020 = vperm.xlu2 %1383, %v737_v5  }
 0x1e9   : > { %v826_v10 = vpop.permute.xlu2 %825 }
 0x1ea   : > { %v828_v36 = vmul.f32 %v826_v10, %v1578_v20 }
 0x1ee   : > { %1032 = vperm.xlu1 %1386, %v739_v6   ;;  %1387 = vset.pattern.permute.xlu2 %v1454_v8 }
 0x1ef   : > { %963 = vperm.xlu2 %1387, %v740_v7  }
 0x1f2   : > { %v762_v11 = vpop.permute.xlu2 %761 }
 0x1f3   : > { %v764_v46 = vmul.f32 %v762_v11, %v1586_v22 }
 0x1f7   : > { %1388 = vset.pattern.permute.xlu2 %v1455_v9 }
 0x1f8   : > { %1038 = vperm.xlu2 %1388, %v740_v7  }
 0x1fa   : > { %v771_v31 = vpop.permute.xlu2 %770 }
 0x1fb   : > { %v773_v53 = vmul.f32 %v771_v31, %v1594_v24 }
 0x200   : > { %v831_v14 = vpop.permute.xlu0 %830  ;;  %v754_v15 = vpop.permute.xlu1 %753 }
 0x201   : > { %v833_v33 = vmul.f32 %v831_v14, %v1586_v22  ;;  %v756_v44 = vmul.f32 %v754_v15, %v1578_v20  ;;  %v970_v14 = vld [vmem:[%s1815_s4 + $0x50] sm:$0xff]  ;;  %v969_v15 = vld [vmem:[%s1815_s4 + $0x48] sm:$0xff] }
 0x202   : > { %988 = vmatpush.msra.mxu2 %v970_v14  ;;  %v1168_v14 = vld [vmem:[%s1643_s17] sm:$0xff] (%p1541_p5) }
 0x203   : > { %v849_v16 = vpop.permute.xlu2 %848  ;;  %v834_v40 = vadd.f32 %v833_v33, %v828_v36  ;;  %v765_v49 = vadd.f32 %v764_v46, %v756_v44  ;;  %1169 = vst [vmem:[%s1125_s11] sm:$0xff] (%p1541_p5), %v1168_v14 }
 0x204   : > { %v851_v48 = vmul.f32 %v849_v16, %v1606_v27  ;;  %v968_v16 = vld [vmem:[%s1815_s4 + $0x40] sm:$0xff]  ;;  %989 = vmatpush.msra.mxu2 %v969_v15  ;;  %v1170_v15 = vld [vmem:[%s1643_s17 + $0x8] sm:$0xff] (%p1541_p5) }
 0x205   : > { %v774_v57 = vadd.f32 %v773_v53, %v765_v49  ;;  %1171 = vst [vmem:[%s1125_s11 + $0x18] sm:$0xff] (%p1541_p5), %v1170_v15 }
 0x206   : > { %990 = vmatpush.msra.mxu2 %v968_v16  ;;  %v1172_v16 = vld [vmem:[%s1643_s17 + $0x10] sm:$0xff] (%p1541_p5) }
 0x207   : > { %1173 = vst [vmem:[%s1125_s11 + $0x30] sm:$0xff] (%p1541_p5), %v1172_v16 }
 0x208   : > { %v843_v18 = vpop.permute.xlu0 %842 }
 0x209   : > { %v837_v28 = vpop.permute.xlu1 %836  ;;  %v845_v43 = vmul.f32 %v843_v18, %v1602_v26 }
 0x20a   : > { %v839_v37 = vmul.f32 %v837_v28, %v1594_v24  ;;  %v1045_v28 = vld [vmem:[%s1815_s4 + $0x70] sm:$0xff] }
 0x20b   : > { %1063 = vmatpush.msra.mxu3 %v1045_v28  ;;  %v1180_v28 = vld [vmem:[%s1643_s17 + $0x30] sm:$0xff] (%p1541_p5) }
 0x20c   : > { %v1694_v32 = vpop.permute.xlu2 %922  ;;  %v840_v41 = vadd.f32 %v839_v37, %v834_v40  ;;  %1181 = vst [vmem:[%s1125_s11 + $0x90] sm:$0xff] (%p1541_p5), %v1180_v28 }
 0x20d   : > { %v925_v36 = vmul.f32 %v1694_v32, %v1578_v20  ;;  %1064 = vmatpush.msra.mxu3 %v1044_v29  ;;  %v1182_v29 = vld [vmem:[%s1643_s17 + $0x38] sm:$0xff] (%p1541_p5) }
 0x20e   : > { %v846_v45 = vadd.f32 %v845_v43, %v840_v41  ;;  %1183 = vst [vmem:[%s1125_s11 + $0xa8] sm:$0xff] (%p1541_p5), %v1182_v29 }
 0x20f   : > { %1065 = vmatpush.msra.mxu3 %v1043_v35 }
 0x210   : > { %v852_v51 = vadd.f32 %v851_v48, %v846_v45 }
 0x211   : > { %v789_v38 = vpop.permute.xlu0 %788 }
 0x212   : > { %v780_v39 = vpop.permute.xlu1 %779  ;;  %v791_v63 = vmul.f32 %v789_v38, %v1606_v27 }
 0x213   : > { %v782_v54 = vmul.f32 %v780_v39, %v1602_v26 }
 0x215   : > { %v798_v42 = vpop.permute.xlu2 %797  ;;  %v783_v59 = vadd.f32 %v782_v54, %v774_v57 }
 0x216   : > { %v800_v4 = vmul.f32 %v798_v42, %v1580_v21 }
 0x217   : > { %v792_v2 = vadd.f32 %v791_v63, %v783_v59 }
 0x219   : > { %v801_v6 = vadd.f32 %v800_v4, %v792_v2 }
 0x21a   : > { %v861_v47 = vpop.permute.xlu0 %860 }
 0x21b   : > { %v863_v58 = vmul.f32 %v861_v47, %v1588_v23 }
 0x21c   : > { %v855_v50 = vpop.permute.xlu1 %854 }
 0x21d   : > { %v857_v52 = vmul.f32 %v855_v50, %v1580_v21 }
 0x21e   : > { %v998_v55 = vpop.permute.xlu2 %997 }
 0x21f   : > { %v858_v56 = vadd.f32 %v857_v52, %v852_v51  ;;  %v1000_v50 = vmul.f32 %v998_v55, %v1578_v20 }
 0x221   : > { %v864_v61 = vadd.f32 %v863_v58, %v858_v56 }
 0x222   : > { %v867_v60 = vpop.permute.xlu0 %866 }
 0x223   : > { %v869_v62 = vmul.f32 %v867_v60, %v1596_v25 }
 0x225   : > { %v870_v0 = vadd.f32 %v869_v62, %v864_v61  ;;  %v928_v1 = vpop.permute.xlu1 %927 }
 0x226   : > { %v930_v30 = vmul.f32 %v928_v1, %v1586_v22 }
 0x227   : > { %v807_v3 = vpop.permute.xlu2 %806  ;;  %1321 = vmatmul.msk.f32.vlgmr.msrb.gmra.mxu2 %vm496_vm0, %v870_v0 }
 0x228   : > { %v809_v5 = vmul.f32 %v807_v3, %v1588_v23  ;;  %v931_v38 = vadd.f32 %v930_v30, %v925_v36 }
 0x22a   : > { %v810_v8 = vadd.f32 %v809_v5, %v801_v6 }
 0x22b   : > { %v816_v7 = vpop.permute.xlu0 %815 }
 0x22c   : > { %v818_v9 = vmul.f32 %v816_v7, %v1596_v25  ;;  %v1390_v7 = vld [vmem:[%s1816_s5] ss:$0 sm:$0xff] }
 0x22d   : > { %v934_v10 = vpop.permute.xlu1 %933 }
 0x22e   : > { %v819_v11 = vadd.f32 %v818_v9, %v810_v8  ;;  %v936_v37 = vmul.f32 %v934_v10, %v1594_v24 }
 0x230   : > { %1322 = vmatmul.msk.f32.vlgmr.msrb.gmra.mxu3 %vm496_vm0, %v819_v11  ;;  %v1009_v31 = vpop.permute.xlu2 %1008  ;;  %v937_v40 = vadd.f32 %v936_v37, %v931_v38 }
 0x231   : > { %v1011_v56 = vmul.f32 %v1009_v31, %v1594_v24  ;;  %v1391_v31 = vld [vmem:[%s1818_s7] ss:$0 sm:$0xff] }
 0x234   : > { %v958_v43 = vpop.permute.xlu0 %957 }
 0x235   : > { %v960_v32 = vmul.f32 %v958_v43, %v1588_v23 }
 0x236   : > { %v1003_v12 = vpop.permute.xlu1 %1002 }
 0x237   : > { %v1005_v47 = vmul.f32 %v1003_v12, %v1586_v22 }
 0x238   : > { %v1015_v18 = vpop.permute.xlu2 %1014 }
 0x239   : > { %v1006_v53 = vadd.f32 %v1005_v47, %v1000_v50  ;;  %v1017_v59 = vmul.f32 %v1015_v18, %v1602_v26  ;;  %v1176_v18 = vld [vmem:[%s1643_s17 + $0x20] sm:$0xff] (%p1541_p5) }
 0x23a   : > { %1177 = vst [vmem:[%s1125_s11 + $0x60] sm:$0xff] (%p1541_p5), %v1176_v18 }
 0x23b   : > { %v1012_v58 = vadd.f32 %v1011_v56, %v1006_v53 }
 0x23d   : > { %v1018_v60 = vadd.f32 %v1017_v59, %v1012_v58 }
 0x23f   : > { %v940_v19 = vpop.permute.xlu1 %939 }
 0x240   : > { %v1021_v33 = vpop.permute.xlu2 %1020  ;;  %v942_v39 = vmul.f32 %v940_v19, %v1602_v26  ;;  %v1080_v26 = vld [vmem:[%s1817_s6 + $0x18] sm:$0xff]  ;;  %v1178_v19 = vld [vmem:[%s1643_s17 + $0x28] sm:$0xff] (%p1541_p5) }
 0x241   : > { %v1023_v22 = vmul.f32 %v1021_v33, %v1606_v27  ;;  %1100 = vmatpush.msrb.mxu2 %v1080_v26  ;;  %1179 = vst [vmem:[%s1125_s11 + $0x78] sm:$0xff] (%p1541_p5), %v1178_v19 }
 0x242   : > { %v943_v42 = vadd.f32 %v942_v39, %v937_v40 }
 0x243   : > { %v1024_v62 = vadd.f32 %v1023_v22, %v1018_v60 }
 0x247   : > { %v946_v34 = vpop.permute.xlu1 %945 }
 0x248   : > { %v948_v41 = vmul.f32 %v946_v34, %v1606_v27  ;;  %v1078_v27 = vld [vmem:[%s1817_s6 + $0x8] sm:$0xff] }
 0x249   : > { %v964_v48 = vpop.permute.xlu2 %963 }
 0x24a   : > { %v949_v45 = vadd.f32 %v948_v41, %v943_v42  ;;  %v966_v51 = vmul.f32 %v964_v48, %v1596_v25 }
 0x24f   : > { %v952_v44 = vpop.permute.xlu1 %951 }
 0x250   : > { %v954_v46 = vmul.f32 %v952_v44, %v1580_v21 }
 0x252   : > { %v955_v49 = vadd.f32 %v954_v46, %v949_v45  ;;  %v1039_v20 = vpop.permute.xlu2 %1038 }
 0x253   : > { %v1041_v1 = vmul.f32 %v1039_v20, %v1596_v25 }
 0x254   : > { %v961_v52 = vadd.f32 %v960_v32, %v955_v49 }
 0x256   : > { %v967_v54 = vadd.f32 %v966_v51, %v961_v52 }
 0x258   : > { %v1027_v57 = vpop.permute.xlu1 %1026  ;;  %1323 = vmatmul.msk.f32.vlgmr.msra.gmra.mxu2 %vm496_vm0, %v967_v54 }
 0x259   : > { %v1029_v61 = vmul.f32 %v1027_v57, %v1580_v21  ;;  %v1079_v21 = vld [vmem:[%s1817_s6 + $0x10] sm:$0xff] }
 0x25a   : > { %1101 = vmatpush.msrb.mxu2 %v1079_v21 }
 0x25b   : > { %v1030_v63 = vadd.f32 %v1029_v61, %v1024_v62 }
 0x25c   : > { %1102 = vmatpush.msrb.mxu2 %v1078_v27 }
 0x260   : > { %v1033_v55 = vpop.permute.xlu1 %1032 }
 0x261   : > { %v1035_v0 = vmul.f32 %v1033_v55, %v1588_v23  ;;  %v1077_v23 = vld [vmem:[%s1817_s6] sm:$0xff] }
 0x262   : > { %1103 = vmatpush.msrb.mxu2 %v1077_v23 }
 0x263   : > { %v1036_v24 = vadd.f32 %v1035_v0, %v1030_v63 }
 0x265   : > { %v1042_v2 = vadd.f32 %v1041_v1, %v1036_v24 }
 0x267   : > { %1324 = vmatmul.msk.f32.vlgmr.msra.gmra.mxu3 %vm496_vm0, %v1042_v2 }
 0x2aa   : > { %v895_v25 = vpop.f32.mrf.mxu2 }
 0x2b3   : > { %v918_v3 = vpop.f32.mrf.mxu3 }
 0x2b4   : > { %v919_v5 = vadd.f32 %v918_v3, %v895_v25 }
 0x2db   : > { %v992_v4 = vpop.f32.mrf.mxu2 }
 0x2dc   : > { %v995_v6 = vadd.f32 %v992_v4, %v919_v5 }
 0x2ea   : > { %v1067_v8 = vpop.f32.mrf.mxu3 }
 0x2eb   : > { %v1070_v9 = vadd.f32 %v1067_v8, %v995_v6 }
 0x2ed   : > { %v1075_v10 = vadd.f32 %v1390_v7, %v1070_v9 }
 0x2ef   : > { %1426 = vtanh.f32 %v1075_v10 }
 0x2f5   : > { %v1427_v11 = vpop.eup %1426 }
 0x2f6   : > { %1325 = vmatmul.msk.f32.vlgmr.msrb.gmra.mxu2 %vm496_vm0, %v1427_v11 }
 0x378   : > { %1123 = sbr.rel (!%p1541_p5) target bundleno = 893 (0x37d), region = 136 }
 0x379   : > { %v1105_v12 = vpop.f32.mrf.mxu2 }
 0x37a   : > { %v1106_v13 = vadd.f32 %v1391_v31, %v1105_v12 }
 0x37c   : > { %1109 = vst.msk [vmem:[%s483_s23] sm:$0xff] %vm1108_vm3, %v1106_v13 }
 0x37d PF: > { %p17_p11 = scmp.ge.s32.totalorder %s1525_s13, 5   ;;  %s1823_s30 = smov %s1446_s10 }
 0x37e   : > { %s1824_s10 = smov %s1535_s16  ;;  %s1825_s11 = smov %s1525_s13 }
 0x37f   :  { %19 = sbr.rel (!%p17_p11) target bundleno = 2 (0x2), region = 228 }

</bundles_post_ra>
